<compile_context>
chip_gen: v5e
topology: v5e:2x2
jax: 0.10.0
libtpu: 0.0.40
codegen_flags: <defaults>
</compile_context>

<pallas_src>
from functools import partial

import jax
import jax.numpy as jnp
from jax import lax
from jax.experimental import pallas as pl
from jax.experimental.pallas import tpu as pltpu


def _conv_stats_kernel(x_ref, w_ref, b_ref, y_ref, stats_ref, *,
                       stride, h_out, w_out, cin):
    """Phase 1: 3x3 conv as a single im2col matmul + BN partial statistics.

    x_ref:     (1, Hq, Wq, cin*stride*stride)  padded (and space-to-depth'd) input
    w_ref:     (9*cin, C_pad)                  conv weight, rows ordered (kh, kw, cin)
    b_ref:     (1, C_pad)                      conv bias
    y_ref:     (1, h_out, w_out, C_pad)        conv output (f32), lane-dense
    stats_ref: (2, C_pad)                      resident [sum; sum_sq] accumulator
    """
    # Init the resident stats accumulator on the first grid step.
    @pl.when(pl.program_id(0) == 0)
    def _():
        stats_ref[...] = jnp.zeros_like(stats_ref)

    s = stride
    taps = []
    for kh in range(3):
        for kw in range(3):
            pi = (kh % s) * s + (kw % s)          # parity plane (space-to-depth)
            r0, c0 = kh // s, kw // s
            t = x_ref[0, r0:r0 + h_out, c0:c0 + w_out, pi * cin:(pi + 1) * cin]
            taps.append(t)                        # (h_out, w_out, cin)

    # im2col tile: columns ordered (kh, kw, cin) to match w_ref rows.
    patches = jnp.concatenate(taps, axis=-1)      # (h_out, w_out, 9*cin)
    patches = patches.reshape(h_out * w_out, 9 * cin)

    # One MXU matmul, f32 accumulation (no explicit astype of the operands).
    acc = jnp.dot(patches, w_ref[...], preferred_element_type=jnp.float32)
    acc = acc + b_ref[...].astype(jnp.float32)    # (rows, C_pad)

    y_ref[...] = acc.reshape(1, h_out, w_out, acc.shape[-1])

    # BN partial statistics, fused with the conv epilogue (lane-dense layout).
    ssum = jnp.sum(acc, axis=0, keepdims=True)
    ssq = jnp.sum(acc * acc, axis=0, keepdims=True)
    stats_ref[...] += jnp.concatenate([ssum, ssq], axis=0)


def _bn_relu_kernel(y_ref, scale_ref, shift_ref, o_ref):
    """Phase 2: y * scale + shift (folded mean/var/gamma/beta), then ReLU."""
    y = y_ref[...]
    o_ref[...] = jnp.maximum(y * scale_ref[...] + shift_ref[...],
                             0.0).astype(o_ref.dtype)


def _vmem_limit(*block_nbytes):
    """Explicit scoped-VMEM budget: double-buffered blocks + headroom, capped."""
    need = 2 * sum(int(b) for b in block_nbytes) + (1 << 20)
    try:
        cap = int(pltpu.get_tpu_info().vmem_capacity_bytes) * 3 // 4
    except Exception:
        cap = 32 * 1024 * 1024
    return int(min(max(need, 8 * 1024 * 1024), cap))


@partial(jax.jit, static_argnames=("reduce_size", "eps"))
def conv_block_forward(x_nchw, weight, bias, gamma, beta, *, reduce_size=False,
                       eps=1e-5):
    """Matches ConvBlock.forward: conv(3x3, pad=1, stride=1|2) -> BN -> ReLU."""
    stride = 2 if reduce_size else 1
    n, cin, h, w = x_nchw.shape
    cout = weight.shape[0]
    h_out = (h + 2 - 3) // stride + 1
    w_out = (w + 2 - 3) // stride + 1
    c_pad = max(128, ((cout + 127) // 128) * 128)      # lane-dense channels

    # ---- wrapper glue (fused into one XLA pass under jit) -----------------
    # TODO(synk): keep the network NHWC end-to-end and fold the spatial pad
    # into a halo-fetching row-tiled BlockSpec to remove these HBM passes (and
    # to tile H for images whose per-image block would not fit v7x VMEM).
    x = jnp.transpose(x_nchw, (0, 2, 3, 1))            # NCHW -> NHWC
    xp = jnp.pad(x, ((0, 0), (1, 1), (1, 1), (0, 0)))  # spatial pad 1
    hp, wp = h + 2, w + 2
    if stride > 1:
        # space-to-depth so the kernel only needs contiguous slices.
        ph, pw = (-hp) % stride, (-wp) % stride
        xp = jnp.pad(xp, ((0, 0), (0, ph), (0, pw), (0, 0)))
        hq, wq = (hp + ph) // stride, (wp + pw) // stride
        xp = xp.reshape(n, hq, stride, wq, stride, cin)
        xp = xp.transpose(0, 1, 3, 2, 4, 5).reshape(n, hq, wq,
                                                    stride * stride * cin)
    else:
        hq, wq = hp, wp
    cin_pk = cin * stride * stride

    # (Cout, Cin, 3, 3) -> (9*Cin, Cout), rows ordered (kh, kw, cin); pad lanes.
    w_mat = jnp.transpose(weight, (2, 3, 1, 0)).reshape(9 * cin, cout)
    w_mat = jnp.pad(w_mat, ((0, 0), (0, c_pad - cout)))
    b_row = jnp.pad(bias.astype(jnp.float32).reshape(1, cout),
                    ((0, 0), (0, c_pad - cout)))
    g_row = jnp.pad(gamma.astype(jnp.float32).reshape(1, cout),
                    ((0, 0), (0, c_pad - cout)))
    bt_row = jnp.pad(beta.astype(jnp.float32).reshape(1, cout),
                     ((0, 0), (0, c_pad - cout)))

    x_blk = hq * wq * cin_pk * xp.dtype.itemsize
    y_blk = h_out * w_out * c_pad * 4
    w_bytes = w_mat.size * w_mat.dtype.itemsize

    # ---- phase 1: conv + per-channel sum / sum_sq -------------------------
    y_conv, stats = pl.pallas_call(
        partial(_conv_stats_kernel, stride=stride, h_out=h_out, w_out=w_out,
                cin=cin),
        grid=(n,),
        in_specs=[
            pl.BlockSpec((1, hq, wq, cin_pk), lambda i: (i, 0, 0, 0)),
            pl.BlockSpec((9 * cin, c_pad), lambda i: (0, 0)),
            pl.BlockSpec((1, c_pad), lambda i: (0, 0)),
        ],
        out_specs=[
            pl.BlockSpec((1, h_out, w_out, c_pad), lambda i: (i, 0, 0, 0)),
            pl.BlockSpec((2, c_pad), lambda i: (0, 0)),
        ],
        out_shape=[
            jax.ShapeDtypeStruct((n, h_out, w_out, c_pad), jnp.float32),
            jax.ShapeDtypeStruct((2, c_pad), jnp.float32),
        ],
        compiler_params=pltpu.CompilerParams(
            dimension_semantics=("arbitrary",),   # resident stats accumulator
            vmem_limit_bytes=_vmem_limit(x_blk, y_blk, w_bytes, 3 * c_pad * 4)),
    )(xp, w_mat, b_row)

    # ---- tiny global BN statistics (per-channel), plain XLA ---------------
    count = jnp.float32(n * h_out * w_out)
    mean = stats[0:1] / count
    var = jnp.maximum(stats[1:2] / count - mean * mean, 0.0)   # biased (train)
    inv_std = lax.rsqrt(var + jnp.float32(eps))
    scale = g_row * inv_std                      # (1, c_pad)
    shift = bt_row - mean * scale                # (1, c_pad)

    # ---- phase 2: normalize + affine + ReLU, parallel over batch ----------
    out_pad = pl.pallas_call(
        _bn_relu_kernel,
        grid=(n,),
        in_specs=[
            pl.BlockSpec((1, h_out, w_out, c_pad), lambda i: (i, 0, 0, 0)),
            pl.BlockSpec((1, c_pad), lambda i: (0, 0)),
            pl.BlockSpec((1, c_pad), lambda i: (0, 0)),
        ],
        out_specs=pl.BlockSpec((1, h_out, w_out, c_pad), lambda i: (i, 0, 0, 0)),
        out_shape=jax.ShapeDtypeStruct((n, h_out, w_out, c_pad), x.dtype),
        compiler_params=pltpu.CompilerParams(
            dimension_semantics=("parallel",),    # shards across v7x's 2 TCs
            vmem_limit_bytes=_vmem_limit(y_blk, y_blk, 2 * c_pad * 4)),
    )(y_conv, scale, shift)

    out = out_pad[..., :cout]                     # drop lane padding
    return jnp.transpose(out, (0, 3, 1, 2))       # NHWC -> NCHW


def _reference(x_nchw, weight, bias, gamma, beta, *, reduce_size=False,
               eps=1e-5):
    """Plain-JAX reference (conv_general_dilated + manual train-mode BN + ReLU)."""
    stride = 2 if reduce_size else 1
    y = lax.conv_general_dilated(
        x_nchw, weight, window_strides=(stride, stride),
        padding=((1, 1), (1, 1)),
        dimension_numbers=("NCHW", "OIHW", "NCHW"))
    y = y + bias[None, :, None, None]
    mean = jnp.mean(y, axis=(0, 2, 3), keepdims=True)
    var = jnp.mean((y - mean) ** 2, axis=(0, 2, 3), keepdims=True)
    y = (y - mean) * lax.rsqrt(var + eps)
    y = y * gamma[None, :, None, None] + beta[None, :, None, None]
    return jnp.maximum(y, 0.0)


if __name__ == "__main__":
    # Small shapes consistent with ConvBlock(in_channels=4, out_channels=8).
    N, CIN, COUT, H, W = 2, 4, 8, 16, 16

    key = jax.random.PRNGKey(0)
    kx, kw_, kb, kg, kbeta = jax.random.split(key, 5)

    x = jax.random.normal(kx, (N, CIN, H, W), dtype=jnp.float32)
    conv_w = jax.random.normal(kw_, (COUT, CIN, 3, 3), dtype=jnp.float32) * 0.1
    conv_b = jax.random.normal(kb, (COUT,), dtype=jnp.float32) * 0.1
    bn_gamma = 1.0 + 0.1 * jax.random.normal(kg, (COUT,), dtype=jnp.float32)
    bn_beta = 0.1 * jax.random.normal(kbeta, (COUT,), dtype=jnp.float32)

    # TODO(synk): BatchNorm2d running_mean/running_var EMA updates (training
    # buffers) are not modeled; only the activation output is produced.
    for reduce_size in (False, True):   # stride 1 and stride 2 paths
        out = jax.block_until_ready(
            conv_block_forward(x, conv_w, conv_b, bn_gamma, bn_beta,
                               reduce_size=reduce_size))
        ref = jax.block_until_ready(
            _reference(x, conv_w, conv_b, bn_gamma, bn_beta,
                       reduce_size=reduce_size))
        assert out.shape == ref.shape, (out.shape, ref.shape)
        assert jnp.allclose(out, ref, atol=1e-3, rtol=1e-3), (
            reduce_size, float(jnp.max(jnp.abs(out - ref))))

    print("KERNEL_OK")
</pallas_src>

<mosaic_0001>
module attributes {stable_mosaic.version = 11 : i64} {
  func.func @_bn_relu_kernel(%arg0: i32, %arg1: memref<1x16x16x128xf32, #tpu.memory_space<vmem>>, %arg2: memref<1x128xf32, #tpu.memory_space<vmem>>, %arg3: memref<1x128xf32, #tpu.memory_space<vmem>>, %arg4: memref<1x16x16x128xf32, #tpu.memory_space<vmem>>) attributes {dimension_semantics = [#tpu.dimension_semantics<parallel>], iteration_bounds = array<i64: 2>, scalar_prefetch = 0 : i64, scratch_operands = 0 : i64, tpu.core_type = #tpu.core_type<tc>, window_params = [{transform_indices = @transform_0, window_bounds = array<i64: 1, 16, 16, 128>}, {pipeline_mode = #tpu.pipeline_mode<synchronous>, transform_indices = @transform_1, window_bounds = array<i64: 1, 128>}, {pipeline_mode = #tpu.pipeline_mode<synchronous>, transform_indices = @transform_2, window_bounds = array<i64: 1, 128>}, {transform_indices = @transform_3, window_bounds = array<i64: 1, 16, 16, 128>}]} {
    %c0 = arith.constant 0 : index
    %c0_0 = arith.constant 0 : index
    %c0_1 = arith.constant 0 : index
    %c0_2 = arith.constant 0 : index
    %0 = vector.load %arg1[%c0, %c0_0, %c0_1, %c0_2] : memref<1x16x16x128xf32, #tpu.memory_space<vmem>>, vector<1x16x16x128xf32>
    %c0_3 = arith.constant 0 : index
    %c0_4 = arith.constant 0 : index
    %1 = vector.load %arg2[%c0_3, %c0_4] : memref<1x128xf32, #tpu.memory_space<vmem>>, vector<1x128xf32>
    %2 = vector.shape_cast %1 : vector<1x128xf32> to vector<1x1x1x128xf32>
    %3 = vector.broadcast %2 : vector<1x1x1x128xf32> to vector<1x16x16x128xf32>
    %4 = arith.mulf %0, %3 : vector<1x16x16x128xf32>
    %c0_5 = arith.constant 0 : index
    %c0_6 = arith.constant 0 : index
    %5 = vector.load %arg3[%c0_5, %c0_6] : memref<1x128xf32, #tpu.memory_space<vmem>>, vector<1x128xf32>
    %6 = vector.shape_cast %5 : vector<1x128xf32> to vector<1x1x1x128xf32>
    %7 = vector.broadcast %6 : vector<1x1x1x128xf32> to vector<1x16x16x128xf32>
    %8 = arith.addf %4, %7 : vector<1x16x16x128xf32>
    %cst = arith.constant 0.000000e+00 : f32
    %9 = vector.broadcast %cst : f32 to vector<1x16x16x128xf32>
    %10 = arith.maximumf %8, %9 : vector<1x16x16x128xf32>
    %c0_7 = arith.constant 0 : index
    %c0_8 = arith.constant 0 : index
    %c0_9 = arith.constant 0 : index
    %c0_10 = arith.constant 0 : index
    %11 = vector.load %arg4[%c0_7, %c0_8, %c0_9, %c0_10] : memref<1x16x16x128xf32, #tpu.memory_space<vmem>>, vector<1x16x16x128xf32>
    tpu.vector_store %arg4[%c0_7, %c0_8, %c0_9, %c0_10], %10 {strides = array<i32>} : memref<1x16x16x128xf32, #tpu.memory_space<vmem>>, vector<1x16x16x128xf32>,
    return
  }
  func.func @transform_0(%arg0: i32) -> (i32, i32, i32, i32) {
    %c0_i32 = arith.constant 0 : i32
    %c0_i32_0 = arith.constant 0 : i32
    %c0_i32_1 = arith.constant 0 : i32
    %c0_i32_2 = arith.constant 0 : i32
    return %arg0, %c0_i32, %c0_i32_0, %c0_i32_1 : i32, i32, i32, i32
  }
  func.func @transform_1(%arg0: i32) -> (i32, i32) {
    %c0_i32 = arith.constant 0 : i32
    %c0_i32_0 = arith.constant 0 : i32
    %c0_i32_1 = arith.constant 0 : i32
    return %c0_i32, %c0_i32_0 : i32, i32
  }
  func.func @transform_2(%arg0: i32) -> (i32, i32) {
    %c0_i32 = arith.constant 0 : i32
    %c0_i32_0 = arith.constant 0 : i32
    %c0_i32_1 = arith.constant 0 : i32
    return %c0_i32, %c0_i32_0 : i32, i32
  }
  func.func @transform_3(%arg0: i32) -> (i32, i32, i32, i32) {
    %c0_i32 = arith.constant 0 : i32
    %c0_i32_0 = arith.constant 0 : i32
    %c0_i32_1 = arith.constant 0 : i32
    %c0_i32_2 = arith.constant 0 : i32
    return %arg0, %c0_i32, %c0_i32_0, %c0_i32_1 : i32, i32, i32, i32
  }
}

module attributes {stable_mosaic.version = 11 : i64} {
  func.func @_conv_stats_kernel(%arg0: i32, %arg1: memref<1x18x18x4xf32, #tpu.memory_space<vmem>>, %arg2: memref<36x128xf32, #tpu.memory_space<vmem>>, %arg3: memref<1x128xf32, #tpu.memory_space<vmem>>, %arg4: memref<1x16x16x128xf32, #tpu.memory_space<vmem>>, %arg5: memref<2x128xf32, #tpu.memory_space<vmem>>) attributes {dimension_semantics = [#tpu.dimension_semantics<arbitrary>], iteration_bounds = array<i64: 2>, scalar_prefetch = 0 : i64, scratch_operands = 0 : i64, tpu.core_type = #tpu.core_type<tc>, window_params = [{transform_indices = @transform_0, window_bounds = array<i64: 1, 18, 18, 4>}, {pipeline_mode = #tpu.pipeline_mode<synchronous>, transform_indices = @transform_1, window_bounds = array<i64: 36, 128>}, {pipeline_mode = #tpu.pipeline_mode<synchronous>, transform_indices = @transform_2, window_bounds = array<i64: 1, 128>}, {transform_indices = @transform_3, window_bounds = array<i64: 1, 16, 16, 128>}, {pipeline_mode = #tpu.pipeline_mode<synchronous>, transform_indices = @transform_4, window_bounds = array<i64: 2, 128>}]} {
    %c0_i32 = arith.constant 0 : i32
    %0 = arith.cmpi eq, %arg0, %c0_i32 : i32
    %1 = arith.extui %0 : i1 to i32
    %c0_i32_0 = arith.constant 0 : i32
    %2 = arith.cmpi ne, %1, %c0_i32_0 : i32
    scf.if %2 {
      %cst_48 = arith.constant 0.000000e+00 : f32
      %39 = vector.broadcast %cst_48 : f32 to vector<2x128xf32>
      %c0_49 = arith.constant 0 : index
      %c0_50 = arith.constant 0 : index
      %40 = vector.load %arg5[%c0_49, %c0_50] : memref<2x128xf32, #tpu.memory_space<vmem>>, vector<2x128xf32>
      tpu.vector_store %arg5[%c0_49, %c0_50], %39 {strides = array<i32>} : memref<2x128xf32, #tpu.memory_space<vmem>>, vector<2x128xf32>,
    } else {
    }
    %c0 = arith.constant 0 : index
    %c0_1 = arith.constant 0 : index
    %c0_2 = arith.constant 0 : index
    %c0_3 = arith.constant 0 : index
    %3 = vector.load %arg1[%c0, %c0_1, %c0_2, %c0_3] : memref<1x18x18x4xf32, #tpu.memory_space<vmem>>, vector<1x16x16x4xf32>
    %4 = vector.shape_cast %3 : vector<1x16x16x4xf32> to vector<16x16x4xf32>
    %c0_4 = arith.constant 0 : index
    %c0_5 = arith.constant 0 : index
    %c1 = arith.constant 1 : index
    %c0_6 = arith.constant 0 : index
    %5 = vector.load %arg1[%c0_4, %c0_5, %c1, %c0_6] : memref<1x18x18x4xf32, #tpu.memory_space<vmem>>, vector<1x16x16x4xf32>
    %6 = vector.shape_cast %5 : vector<1x16x16x4xf32> to vector<16x16x4xf32>
    %c0_7 = arith.constant 0 : index
    %c0_8 = arith.constant 0 : index
    %c2 = arith.constant 2 : index
    %c0_9 = arith.constant 0 : index
    %7 = vector.load %arg1[%c0_7, %c0_8, %c2, %c0_9] : memref<1x18x18x4xf32, #tpu.memory_space<vmem>>, vector<1x16x16x4xf32>
    %8 = vector.shape_cast %7 : vector<1x16x16x4xf32> to vector<16x16x4xf32>
    %c0_10 = arith.constant 0 : index
    %c1_11 = arith.constant 1 : index
    %c0_12 = arith.constant 0 : index
    %c0_13 = arith.constant 0 : index
    %9 = vector.load %arg1[%c0_10, %c1_11, %c0_12, %c0_13] : memref<1x18x18x4xf32, #tpu.memory_space<vmem>>, vector<1x16x16x4xf32>
    %10 = vector.shape_cast %9 : vector<1x16x16x4xf32> to vector<16x16x4xf32>
    %c0_14 = arith.constant 0 : index
    %c1_15 = arith.constant 1 : index
    %c1_16 = arith.constant 1 : index
    %c0_17 = arith.constant 0 : index
    %11 = vector.load %arg1[%c0_14, %c1_15, %c1_16, %c0_17] : memref<1x18x18x4xf32, #tpu.memory_space<vmem>>, vector<1x16x16x4xf32>
    %12 = vector.shape_cast %11 : vector<1x16x16x4xf32> to vector<16x16x4xf32>
    %c0_18 = arith.constant 0 : index
    %c1_19 = arith.constant 1 : index
    %c2_20 = arith.constant 2 : index
    %c0_21 = arith.constant 0 : index
    %13 = vector.load %arg1[%c0_18, %c1_19, %c2_20, %c0_21] : memref<1x18x18x4xf32, #tpu.memory_space<vmem>>, vector<1x16x16x4xf32>
    %14 = vector.shape_cast %13 : vector<1x16x16x4xf32> to vector<16x16x4xf32>
    %c0_22 = arith.constant 0 : index
    %c2_23 = arith.constant 2 : index
    %c0_24 = arith.constant 0 : index
    %c0_25 = arith.constant 0 : index
    %15 = vector.load %arg1[%c0_22, %c2_23, %c0_24, %c0_25] : memref<1x18x18x4xf32, #tpu.memory_space<vmem>>, vector<1x16x16x4xf32>
    %16 = vector.shape_cast %15 : vector<1x16x16x4xf32> to vector<16x16x4xf32>
    %c0_26 = arith.constant 0 : index
    %c2_27 = arith.constant 2 : index
    %c1_28 = arith.constant 1 : index
    %c0_29 = arith.constant 0 : index
    %17 = vector.load %arg1[%c0_26, %c2_27, %c1_28, %c0_29] : memref<1x18x18x4xf32, #tpu.memory_space<vmem>>, vector<1x16x16x4xf32>
    %18 = vector.shape_cast %17 : vector<1x16x16x4xf32> to vector<16x16x4xf32>
    %c0_30 = arith.constant 0 : index
    %c2_31 = arith.constant 2 : index
    %c2_32 = arith.constant 2 : index
    %c0_33 = arith.constant 0 : index
    %19 = vector.load %arg1[%c0_30, %c2_31, %c2_32, %c0_33] : memref<1x18x18x4xf32, #tpu.memory_space<vmem>>, vector<1x16x16x4xf32>
    %20 = vector.shape_cast %19 : vector<1x16x16x4xf32> to vector<16x16x4xf32>
    %21 = tpu.concatenate %4, %6, %8, %10, %12, %14, %16, %18, %20 in 2 : vector<16x16x4xf32>, vector<16x16x4xf32>, vector<16x16x4xf32>, vector<16x16x4xf32>, vector<16x16x4xf32>, vector<16x16x4xf32>, vector<16x16x4xf32>, vector<16x16x4xf32>, vector<16x16x4xf32> -> vector<16x16x36xf32>
    %22 = vector.shape_cast %21 : vector<16x16x36xf32> to vector<256x36xf32>
    %c0_34 = arith.constant 0 : index
    %c0_35 = arith.constant 0 : index
    %23 = vector.load %arg2[%c0_34, %c0_35] : memref<36x128xf32, #tpu.memory_space<vmem>>, vector<36x128xf32>
    %cst = arith.constant dense<0.000000e+00> : vector<256x128xf32>
    %24 = tpu.matmul %22, %23, %cst {dimension_numbers = #tpu.dot_dimension_numbers<[1], [0], [0], [1], [0, 0, 1, 1], [], []>} : vector<256x36xf32>, vector<36x128xf32>, vector<256x128xf32> -> vector<256x128xf32>
    %c0_36 = arith.constant 0 : index
    %c0_37 = arith.constant 0 : index
    %25 = vector.load %arg3[%c0_36, %c0_37] : memref<1x128xf32, #tpu.memory_space<vmem>>, vector<1x128xf32>
    %26 = vector.broadcast %25 : vector<1x128xf32> to vector<256x128xf32>
    %27 = arith.addf %24, %26 : vector<256x128xf32>
    %28 = vector.shape_cast %27 : vector<256x128xf32> to vector<1x16x16x128xf32>
    %c0_38 = arith.constant 0 : index
    %c0_39 = arith.constant 0 : index
    %c0_40 = arith.constant 0 : index
    %c0_41 = arith.constant 0 : index
    %29 = vector.load %arg4[%c0_38, %c0_39, %c0_40, %c0_41] : memref<1x16x16x128xf32, #tpu.memory_space<vmem>>, vector<1x16x16x128xf32>
    tpu.vector_store %arg4[%c0_38, %c0_39, %c0_40, %c0_41], %28 {strides = array<i32>} : memref<1x16x16x128xf32, #tpu.memory_space<vmem>>, vector<1x16x16x128xf32>,
    %cst_42 = arith.constant dense<0.000000e+00> : vector<128xf32>
    %30 = vector.multi_reduction <add>, %27, %cst_42 [0] : vector<256x128xf32> to vector<128xf32>
    %31 = vector.shape_cast %30 : vector<128xf32> to vector<1x128xf32>
    %32 = arith.mulf %27, %27 : vector<256x128xf32>
    %cst_43 = arith.constant dense<0.000000e+00> : vector<128xf32>
    %33 = vector.multi_reduction <add>, %32, %cst_43 [0] : vector<256x128xf32> to vector<128xf32>
    %34 = vector.shape_cast %33 : vector<128xf32> to vector<1x128xf32>
    %c0_44 = arith.constant 0 : index
    %c0_45 = arith.constant 0 : index
    %35 = vector.load %arg5[%c0_44, %c0_45] : memref<2x128xf32, #tpu.memory_space<vmem>>, vector<2x128xf32>
    %36 = tpu.concatenate %31, %34 in 0 : vector<1x128xf32>, vector<1x128xf32> -> vector<2x128xf32>
    %37 = arith.addf %35, %36 : vector<2x128xf32>
    %c0_46 = arith.constant 0 : index
    %c0_47 = arith.constant 0 : index
    %38 = vector.load %arg5[%c0_46, %c0_47] : memref<2x128xf32, #tpu.memory_space<vmem>>, vector<2x128xf32>
    tpu.vector_store %arg5[%c0_46, %c0_47], %37 {strides = array<i32>} : memref<2x128xf32, #tpu.memory_space<vmem>>, vector<2x128xf32>,
    return
  }
  func.func @transform_0(%arg0: i32) -> (i32, i32, i32, i32) {
    %c0_i32 = arith.constant 0 : i32
    %c0_i32_0 = arith.constant 0 : i32
    %c0_i32_1 = arith.constant 0 : i32
    %c0_i32_2 = arith.constant 0 : i32
    return %arg0, %c0_i32, %c0_i32_0, %c0_i32_1 : i32, i32, i32, i32
  }
  func.func @transform_1(%arg0: i32) -> (i32, i32) {
    %c0_i32 = arith.constant 0 : i32
    %c0_i32_0 = arith.constant 0 : i32
    %c0_i32_1 = arith.constant 0 : i32
    return %c0_i32, %c0_i32_0 : i32, i32
  }
  func.func @transform_2(%arg0: i32) -> (i32, i32) {
    %c0_i32 = arith.constant 0 : i32
    %c0_i32_0 = arith.constant 0 : i32
    %c0_i32_1 = arith.constant 0 : i32
    return %c0_i32, %c0_i32_0 : i32, i32
  }
  func.func @transform_3(%arg0: i32) -> (i32, i32, i32, i32) {
    %c0_i32 = arith.constant 0 : i32
    %c0_i32_0 = arith.constant 0 : i32
    %c0_i32_1 = arith.constant 0 : i32
    %c0_i32_2 = arith.constant 0 : i32
    return %arg0, %c0_i32, %c0_i32_0, %c0_i32_1 : i32, i32, i32, i32
  }
  func.func @transform_4(%arg0: i32) -> (i32, i32) {
    %c0_i32 = arith.constant 0 : i32
    %c0_i32_0 = arith.constant 0 : i32
    %c0_i32_1 = arith.constant 0 : i32
    return %c0_i32, %c0_i32_0 : i32, i32
  }
}

</mosaic_0001>

<bundles_post_ra>
// kernel: conv_block_forward.3
= control target key start
LH: loop header
LB: loop body
LE: loop exit
PB: predicated region body
PF: predicated region fallthrough
CT: control target
= control target key end

     0   :  { %s445_s12 = smov 0   ;;  %s604_s0 = inlined_call_operand.vmem [shape: f32[2,16,16,128], index: 0, kind: input, shape index: {}]   ;;  %s605_s1 = inlined_call_operand.vmem [shape: f32[1,128], index: 1, kind: input, shape index: {}]   ;;  %s606_s2 = inlined_call_operand.vmem [shape: f32[1,128], index: 2, kind: input, shape index: {}]   ;;  %s607_s3 = inlined_call_operand.vmem [shape: f32[2,16,16,128], index: 3, kind: output, shape index: {}]  }
   0x1 LB: > { %s394_s13 = sadd.s32 4294967295, %s423_s12   ;;  %p398_p0 = scmp.ge.s32.totalorder %s423_s12, 1  ;;  %s423_s12 = sphi %s445_s12, %s13_s12  }
   0x2   : > { %p137_p1 = scmp.lt.s32.totalorder %s423_s12, 3 }
   0x4   : > { %p138_p2 = pnand %p398_p0, %p137_p1 }
   0x5   : > { %p161_p3 = scmp.lt.s32.totalorder (!%p138_p2), %s394_s13, 1 }
   0x6   : > { %141 = sbr.rel (%p138_p2) target bundleno = 53 (0x35), region = 32 }
   0xb   : > { %s609_s13 = smov (!%p161_p3, %s394_s13), 1  ;;  %v456_v0 = vld [vmem:[%s605_s1] ss:$0 sm:$0xff] }
   0xc   : > { %s405_s16 = sshll.u32 %s609_s13, 8  ;;  %v466_v1 = vld [vmem:[%s606_s2] ss:$0 sm:$0xff] }
   0xd   : > { %s461_s19 = scalar_lea.vmem %s604_s0, %s405_s16  ;;  %s489_s24 = scalar_lea.vmem %s607_s3, %s405_s16 }
   0xe   : > { %v171_v2 = vld [vmem:[%s461_s19] sm:$0xff]  ;;  %v172_v3 = vld [vmem:[%s461_s19 + $0x8] sm:$0xff]  ;;  %v173_v4 = vld [vmem:[%s461_s19 + $0x10] sm:$0xff] }
   0xf   : > { %v207_v5 = vmul.f32 %v456_v0, %v171_v2  ;;  %v208_v6 = vmul.f32 %v456_v0, %v172_v3  ;;  %v209_v7 = vmul.f32 %v456_v0, %v173_v4  ;;  %v174_v8 = vld [vmem:[%s461_s19 + $0x18] sm:$0xff]  ;;  %v175_v9 = vld [vmem:[%s461_s19 + $0x20] sm:$0xff]  ;;  %v176_v10 = vld [vmem:[%s461_s19 + $0x28] sm:$0xff] }
  0x10   : > { %v210_v11 = vmul.f32 %v456_v0, %v174_v8  ;;  %v211_v12 = vmul.f32 %v456_v0, %v175_v9  ;;  %v212_v13 = vmul.f32 %v456_v0, %v176_v10  ;;  %v177_v14 = vld [vmem:[%s461_s19 + $0x30] sm:$0xff]  ;;  %v178_v15 = vld [vmem:[%s461_s19 + $0x38] sm:$0xff]  ;;  %v179_v24 = vld [vmem:[%s461_s19 + $0x40] sm:$0xff] }
  0x11   : > { %v243_v16 = vadd.f32 %v466_v1, %v207_v5  ;;  %v244_v17 = vadd.f32 %v466_v1, %v208_v6  ;;  %v245_v18 = vadd.f32 %v466_v1, %v209_v7  ;;  %v213_v19 = vmul.f32 %v456_v0, %v177_v14  ;;  %v180_v25 = vld [vmem:[%s461_s19 + $0x48] sm:$0xff]  ;;  %v181_v26 = vld [vmem:[%s461_s19 + $0x50] sm:$0xff]  ;;  %v182_v31 = vld [vmem:[%s461_s19 + $0x58] sm:$0xff] }
  0x12   : > { %v246_v20 = vadd.f32 %v466_v1, %v210_v11  ;;  %v247_v21 = vadd.f32 %v466_v1, %v211_v12  ;;  %v248_v22 = vadd.f32 %v466_v1, %v212_v13  ;;  %v214_v23 = vmul.f32 %v456_v0, %v178_v15  ;;  %v183_v32 = vld [vmem:[%s461_s19 + $0x60] sm:$0xff]  ;;  %v184_v33 = vld [vmem:[%s461_s19 + $0x68] sm:$0xff]  ;;  %v185_v37 = vld [vmem:[%s461_s19 + $0x70] sm:$0xff] }
  0x13   : > { %v275_v27 = vmax.f32 %v243_v16, 0.0  ;;  %v276_v28 = vmax.f32 %v244_v17, 0.0  ;;  %v277_v29 = vmax.f32 %v245_v18, 0.0  ;;  %v249_v30 = vadd.f32 %v466_v1, %v213_v19  ;;  %v186_v42 = vld [vmem:[%s461_s19 + $0x78] sm:$0xff]  ;;  %v187_v54 = vld [vmem:[%s461_s19 + $0x80] sm:$0xff]  ;;  %v188_v55 = vld [vmem:[%s461_s19 + $0x88] sm:$0xff] }
  0x14   : > { %v278_v34 = vmax.f32 %v246_v20, 0.0  ;;  %v279_v35 = vmax.f32 %v247_v21, 0.0  ;;  %v250_v36 = vadd.f32 %v466_v1, %v214_v23  ;;  %v280_v38 = vmax.f32 %v248_v22, 0.0  ;;  %v189_v56 = vld [vmem:[%s461_s19 + $0x90] sm:$0xff]  ;;  %v190_v59 = vld [vmem:[%s461_s19 + $0x98] sm:$0xff]  ;;  %v191_v63 = vld [vmem:[%s461_s19 + $0xa0] sm:$0xff] }
  0x15   : > { %307 = vst [vmem:[%s489_s24] sm:$0xff] %v275_v27  ;;  %v215_v39 = vmul.f32 %v456_v0, %v179_v24  ;;  %v216_v40 = vmul.f32 %v456_v0, %v180_v25  ;;  %v217_v41 = vmul.f32 %v456_v0, %v181_v26  ;;  %v281_v43 = vmax.f32 %v249_v30, 0.0  ;;  %v192_v6 = vld [vmem:[%s461_s19 + $0xa8] sm:$0xff]  ;;  %v193_v10 = vld [vmem:[%s461_s19 + $0xb0] sm:$0xff]  ;;  %v194_v14 = vld [vmem:[%s461_s19 + $0xb8] sm:$0xff] }
  0x16   : > { %308 = vst [vmem:[%s489_s24 + $0x8] sm:$0xff] %v276_v28  ;;  %v218_v44 = vmul.f32 %v456_v0, %v182_v31  ;;  %v219_v45 = vmul.f32 %v456_v0, %v183_v32  ;;  %v220_v46 = vmul.f32 %v456_v0, %v184_v33  ;;  %v221_v50 = vmul.f32 %v456_v0, %v185_v37  ;;  %v195_v18 = vld [vmem:[%s461_s19 + $0xc0] sm:$0xff]  ;;  %v196_v22 = vld [vmem:[%s461_s19 + $0xc8] sm:$0xff]  ;;  %v197_v26 = vld [vmem:[%s461_s19 + $0xd0] sm:$0xff] }
  0x17   : > { %309 = vst [vmem:[%s489_s24 + $0x10] sm:$0xff] %v277_v29  ;;  %v251_v47 = vadd.f32 %v466_v1, %v215_v39  ;;  %v252_v48 = vadd.f32 %v466_v1, %v216_v40  ;;  %v253_v49 = vadd.f32 %v466_v1, %v217_v41  ;;  %v282_v51 = vmax.f32 %v250_v36, 0.0  ;;  %v198_v30 = vld [vmem:[%s461_s19 + $0xd8] sm:$0xff] }
  0x18   : > { %310 = vst [vmem:[%s489_s24 + $0x18] sm:$0xff] %v278_v34  ;;  %v254_v52 = vadd.f32 %v466_v1, %v218_v44  ;;  %v222_v53 = vmul.f32 %v456_v0, %v186_v42  ;;  %v255_v58 = vadd.f32 %v466_v1, %v219_v45  ;;  %v256_v62 = vadd.f32 %v466_v1, %v220_v46  ;;  %v199_v34 = vld [vmem:[%s461_s19 + $0xe0] sm:$0xff]  ;;  %v201_v42 = vld [vmem:[%s461_s19 + $0xf0] sm:$0xff]  ;;  %v202_v46 = vld [vmem:[%s461_s19 + $0xf8] sm:$0xff] }
  0x19   : > { %311 = vst [vmem:[%s489_s24 + $0x20] sm:$0xff] %v279_v35  ;;  %v283_v57 = vmax.f32 %v251_v47, 0.0  ;;  %v284_v60 = vmax.f32 %v252_v48, 0.0  ;;  %v285_v61 = vmax.f32 %v253_v49, 0.0  ;;  %v257_v2 = vadd.f32 %v466_v1, %v221_v50 }
  0x1a   : > { %312 = vst [vmem:[%s489_s24 + $0x28] sm:$0xff] %v280_v38  ;;  %v223_v3 = vmul.f32 %v456_v0, %v187_v54  ;;  %v224_v4 = vmul.f32 %v456_v0, %v188_v55  ;;  %v225_v5 = vmul.f32 %v456_v0, %v189_v56  ;;  %v286_v7 = vmax.f32 %v254_v52, 0.0  ;;  %v200_v38 = vld [vmem:[%s461_s19 + $0xe8] sm:$0xff] }
  0x1b   : > { %313 = vst [vmem:[%s489_s24 + $0x30] sm:$0xff] %v281_v43  ;;  %v258_v8 = vadd.f32 %v466_v1, %v222_v53  ;;  %v226_v9 = vmul.f32 %v456_v0, %v190_v59  ;;  %v287_v11 = vmax.f32 %v255_v58, 0.0  ;;  %v227_v13 = vmul.f32 %v456_v0, %v191_v63 }
  0x1c   : > { %314 = vst [vmem:[%s489_s24 + $0x38] sm:$0xff] %v282_v51  ;;  %v259_v12 = vadd.f32 %v466_v1, %v223_v3  ;;  %v288_v15 = vmax.f32 %v256_v62, 0.0  ;;  %v260_v16 = vadd.f32 %v466_v1, %v224_v4  ;;  %v228_v17 = vmul.f32 %v456_v0, %v192_v6 }
  0x1d   : > { %315 = vst [vmem:[%s489_s24 + $0x40] sm:$0xff] %v283_v57  ;;  %v289_v19 = vmax.f32 %v257_v2, 0.0  ;;  %v261_v20 = vadd.f32 %v466_v1, %v225_v5  ;;  %v229_v21 = vmul.f32 %v456_v0, %v193_v10  ;;  %v290_v23 = vmax.f32 %v258_v8, 0.0 }
  0x1e   : > { %316 = vst [vmem:[%s489_s24 + $0x48] sm:$0xff] %v284_v60  ;;  %v262_v24 = vadd.f32 %v466_v1, %v226_v9  ;;  %v230_v25 = vmul.f32 %v456_v0, %v194_v14  ;;  %v291_v27 = vmax.f32 %v259_v12, 0.0  ;;  %v263_v28 = vadd.f32 %v466_v1, %v227_v13 }
  0x1f   : > { %317 = vst [vmem:[%s489_s24 + $0x50] sm:$0xff] %v285_v61  ;;  %v231_v29 = vmul.f32 %v456_v0, %v195_v18  ;;  %v292_v31 = vmax.f32 %v260_v16, 0.0  ;;  %v264_v32 = vadd.f32 %v466_v1, %v228_v17  ;;  %v232_v33 = vmul.f32 %v456_v0, %v196_v22 }
  0x20   : > { %318 = vst [vmem:[%s489_s24 + $0x58] sm:$0xff] %v286_v7  ;;  %v293_v35 = vmax.f32 %v261_v20, 0.0  ;;  %v265_v36 = vadd.f32 %v466_v1, %v229_v21  ;;  %v233_v37 = vmul.f32 %v456_v0, %v197_v26  ;;  %v294_v39 = vmax.f32 %v262_v24, 0.0 }
  0x21   : > { %319 = vst [vmem:[%s489_s24 + $0x60] sm:$0xff] %v287_v11  ;;  %v266_v40 = vadd.f32 %v466_v1, %v230_v25  ;;  %v234_v41 = vmul.f32 %v456_v0, %v198_v30  ;;  %v295_v43 = vmax.f32 %v263_v28, 0.0  ;;  %v267_v44 = vadd.f32 %v466_v1, %v231_v29 }
  0x22   : > { %320 = vst [vmem:[%s489_s24 + $0x68] sm:$0xff] %v288_v15  ;;  %v235_v45 = vmul.f32 %v456_v0, %v199_v34  ;;  %v296_v47 = vmax.f32 %v264_v32, 0.0  ;;  %v268_v48 = vadd.f32 %v466_v1, %v232_v33  ;;  %v236_v49 = vmul.f32 %v456_v0, %v200_v38 }
  0x23   : > { %321 = vst [vmem:[%s489_s24 + $0x70] sm:$0xff] %v289_v19  ;;  %v297_v50 = vmax.f32 %v265_v36, 0.0  ;;  %v269_v51 = vadd.f32 %v466_v1, %v233_v37  ;;  %v237_v52 = vmul.f32 %v456_v0, %v201_v42  ;;  %v298_v53 = vmax.f32 %v266_v40, 0.0 }
  0x24   : > { %322 = vst [vmem:[%s489_s24 + $0x78] sm:$0xff] %v290_v23  ;;  %v270_v54 = vadd.f32 %v466_v1, %v234_v41  ;;  %v238_v55 = vmul.f32 %v456_v0, %v202_v46  ;;  %v299_v56 = vmax.f32 %v267_v44, 0.0  ;;  %v271_v57 = vadd.f32 %v466_v1, %v235_v45 }
  0x25   : > { %323 = vst [vmem:[%s489_s24 + $0x80] sm:$0xff] %v291_v27  ;;  %v300_v58 = vmax.f32 %v268_v48, 0.0  ;;  %v272_v59 = vadd.f32 %v466_v1, %v236_v49  ;;  %v301_v60 = vmax.f32 %v269_v51, 0.0  ;;  %v273_v61 = vadd.f32 %v466_v1, %v237_v52 }
  0x26   : > { %324 = vst [vmem:[%s489_s24 + $0x88] sm:$0xff] %v292_v31  ;;  %v302_v0 = vmax.f32 %v270_v54, 0.0  ;;  %v274_v62 = vadd.f32 %v466_v1, %v238_v55  ;;  %v303_v63 = vmax.f32 %v271_v57, 0.0 }
  0x27   : > { %325 = vst [vmem:[%s489_s24 + $0x90] sm:$0xff] %v293_v35  ;;  %v304_v2 = vmax.f32 %v272_v59, 0.0  ;;  %v305_v3 = vmax.f32 %v273_v61, 0.0 }
  0x28   : > { %326 = vst [vmem:[%s489_s24 + $0x98] sm:$0xff] %v294_v39  ;;  %v306_v4 = vmax.f32 %v274_v62, 0.0 }
  0x29   : > { %327 = vst [vmem:[%s489_s24 + $0xa0] sm:$0xff] %v295_v43 }
  0x2a   : > { %328 = vst [vmem:[%s489_s24 + $0xa8] sm:$0xff] %v296_v47 }
  0x2b   : > { %329 = vst [vmem:[%s489_s24 + $0xb0] sm:$0xff] %v297_v50 }
  0x2c   : > { %330 = vst [vmem:[%s489_s24 + $0xb8] sm:$0xff] %v298_v53 }
  0x2d   : > { %331 = vst [vmem:[%s489_s24 + $0xc0] sm:$0xff] %v299_v56 }
  0x2e   : > { %332 = vst [vmem:[%s489_s24 + $0xc8] sm:$0xff] %v300_v58 }
  0x2f   : > { %333 = vst [vmem:[%s489_s24 + $0xd0] sm:$0xff] %v301_v60 }
  0x30   : > { %334 = vst [vmem:[%s489_s24 + $0xd8] sm:$0xff] %v302_v0 }
  0x31   : > { %335 = vst [vmem:[%s489_s24 + $0xe0] sm:$0xff] %v303_v63 }
  0x32   : > { %336 = vst [vmem:[%s489_s24 + $0xe8] sm:$0xff] %v304_v2 }
  0x33   : > { %337 = vst [vmem:[%s489_s24 + $0xf0] sm:$0xff] %v305_v3 }
  0x34   : > { %338 = vst [vmem:[%s489_s24 + $0xf8] sm:$0xff] %v306_v4 }
  0x35 PF: > { %s13_s12 = sadd.s32 1, %s423_s12  }
  0x36   : > { %p10_p4 = scmp.ge.s32.totalorder %s13_s12, 4  }
  0x38   :  { %12 = sbr.rel (!%p10_p4) target bundleno = 1 (0x1), region = 62 }

// kernel: conv_block_forward.2
= control target key start
LH: loop header
LB: loop body
LE: loop exit
PB: predicated region body
PF: predicated region fallthrough
CT: control target
= control target key end

     0   :  { %s2526_s15 = smov 0   ;;  %s4305_s0 = inlined_call_operand.vmem [shape: f32[2,18,18,4], index: 0, kind: input, shape index: {}]   ;;  %s4306_s1 = inlined_call_operand.vmem [shape: f32[36,128], index: 1, kind: input, shape index: {}]   ;;  %s4307_s2 = inlined_call_operand.vmem [shape: f32[1,128], index: 2, kind: input, shape index: {}]   ;;  %s4308_s3 = inlined_call_operand.vmem [shape: f32[2,16,16,128], index: 3, kind: output, shape index: {0}]   ;;  %s4309_s4 = inlined_call_operand.vmem [shape: f32[2,128], index: 4, kind: output, shape index: {1}]  }
   0x1 LB: > { %s2206_s16 = sadd.s32 4294967295, %s2490_s15   ;;  %p2210_p0 = scmp.ge.s32.totalorder %s2490_s15, 1  ;;  %s2490_s15 = sphi %s2526_s15, %s15_s15  }
   0x2   : > { %p160_p1 = scmp.lt.s32.totalorder %s2490_s15, 3 }
   0x4   : > { %p161_p2 = pnand %p2210_p0, %p160_p1 }
   0x6   : > { %164 = sbr.rel (%p161_p2) target bundleno = 973 (0x3cd), region = 32 }
   0xb   : > { %p186_p3 = scmp.lt.s32.totalorder %s2206_s16, 1  ;;  %p2214_p4 = scmp.ne.s32.totalorder %s2206_s16, 0 }
   0xd   : > { %s187_s17 = scalar_select %p186_p3, %s2206_s16, 1 }
   0xe   : > { %199 = sbr.rel (%p2214_p4) target bundleno = 21 (0x15), region = 36 }
   0xf   : > { %s2458_s18 = smul.u32 432, %s187_s17  ;;  %s2442_s19 = sshll.u32 %s187_s17, 8 }
  0x10   : > { %s2537_s22 = scalar_lea.vmem %s4308_s3, %s2442_s19 }
  0x11   : > { %s2542_s25 = scalar_lea.vmem %s4305_s0, %s2458_s18 }
  0x13   : > { %v2492_v0 = vmov 0.0  }
  0x14   : > { %200 = vst [vmem:[%s4309_s4] sm:$0x3] %v2492_v0 }
  0x15 PF: > { %v2548_v1 = vld [vmem:[%s2542_s25 + $0x31] sm:$0xff]  ;;  %v2551_v2 = vld [vmem:[%s2542_s25 + $0x19] sm:$0xff]  ;;  %v233_v3 = vld [vmem:[%s2542_s25 + $0x1] sm:$0xff]  ;;  %s2493_s28 = smov 4   ;;  %s2494_s29 = smov 8   ;;  %vm1515_vm0 = vcmask 31744  }
  0x16   : > { %531 = vrot.lane.b32.xlu2 %v2548_v1, %s2493_s28  ;;  %527 = vrot.lane.b32.xlu1 %v2551_v2, %s2493_s28  ;;  %v2560_v4 = vld [vmem:[%s2542_s25 + $0x39] sm:$0xff]  ;;  %v2563_v5 = vld [vmem:[%s2542_s25 + $0x21] sm:$0xff]  ;;  %s2495_s30 = smov 12   ;;  %s2496_s5 = smov 16   ;;  %vm1548_vm1 = vcmask 64512   ;;  %vm1581_vm2 = vcmask 97280  }
  0x17   : > { %523 = vrot.lane.b32.xlu0 %v233_v3, %s2493_s28  ;;  %v234_v6 = vld [vmem:[%s2542_s25 + $0x9] sm:$0xff]  ;;  %v2572_v7 = vld [vmem:[%s2542_s25 + $0x61] sm:$0xff]  ;;  %v2575_v8 = vld [vmem:[%s2542_s25 + $0x51] sm:$0xff]  ;;  %s2497_s6 = smov 20   ;;  %vm1614_vm3 = vcmask 130048   ;;  %s2498_s7 = smov 32  }
  0x18   : > { %v2578_v9 = vld [vmem:[%s2542_s25 + $0x49] sm:$0xff]  ;;  %v2587_v10 = vld [vmem:[%s2542_s25 + $0x81] sm:$0xff]  ;;  %v2590_v11 = vld [vmem:[%s2542_s25 + $0x79] sm:$0xff]  ;;  %s2499_s8 = smov 28   ;;  %s2500_s9 = smov 24   ;;  %vm1647_vm4 = vcmask 162816  }
  0x19   : > { %v2593_v12 = vld [vmem:[%s2542_s25 + $0x69] sm:$0xff]  ;;  %v2605_v14 = vld [vmem:[%s2542_s25 + $0x99] sm:$0xff]  ;;  %v2608_v15 = vld [vmem:[%s2542_s25 + $0x91] sm:$0xff]  ;;  %vm1885_vm5 = vcmask 1043456   ;;  %vm1680_vm6 = vcmask 195584   ;;  %vm1713_vm7 = vcmask 228352  }
  0x1a   : > { %v2602_v13 = vld [vmem:[%s2542_s25 + $0xa9] sm:$0xff]  ;;  %v2620_v17 = vld [vmem:[%s2542_s25 + $0xc1] sm:$0xff]  ;;  %v2623_v18 = vld [vmem:[%s2542_s25 + $0xb1] sm:$0xff]  ;;  %vm1746_vm8 = vcmask 261120   ;;  %vm1788_vm9 = vcmask 293888   ;;  %vm2141_vm10 = vcmask 1040384  }
  0x1b   : > { %v2617_v16 = vld [vmem:[%s2542_s25 + $0xc9] sm:$0xff]  ;;  %v2632_v19 = vld [vmem:[%s2542_s25 + $0xf1] sm:$0xff]  ;;  %v2635_v20 = vld [vmem:[%s2542_s25 + $0xe1] sm:$0xff] }
  0x1c   : > { %v2638_v21 = vld [vmem:[%s2542_s25 + $0xd9] sm:$0xff]  ;;  %v2647_v22 = vld [vmem:[%s2542_s25 + $0x111] sm:$0xff]  ;;  %v2650_v23 = vld [vmem:[%s2542_s25 + $0x109] sm:$0xff] }
  0x1d   : > { %v2653_v24 = vld [vmem:[%s2542_s25 + $0xf9] sm:$0xff]  ;;  %v2665_v26 = vld [vmem:[%s2542_s25 + $0x129] sm:$0xff]  ;;  %v2668_v27 = vld [vmem:[%s2542_s25 + $0x121] sm:$0xff] }
  0x1e   : > { %533 = vrot.lane.b32.xlu2 %v2560_v4, %s2493_s28  ;;  %529 = vrot.lane.b32.xlu1 %v2563_v5, %s2493_s28  ;;  %v2662_v25 = vld [vmem:[%s2542_s25 + $0x139] sm:$0xff]  ;;  %v2680_v29 = vld [vmem:[%s2542_s25 + $0x151] sm:$0xff] }
  0x1f   : > { %525 = vrot.lane.b32.xlu0 %v234_v6, %s2493_s28  ;;  %v2677_v28 = vld [vmem:[%s2542_s25 + $0x159] sm:$0xff]  ;;  %v2683_v30 = vld [vmem:[%s2542_s25 + $0x141] sm:$0xff]  ;;  %v2693_v32 = vld [vmem:[%s2542_s25 + $0x171] sm:$0xff] }
  0x20   : > { %v265_v31 = vld [vmem:[%s2542_s25 + $0x2] sm:$0xff]  ;;  %v2707_v35 = vld [vmem:[%s2542_s25 + $0x1a] sm:$0xff]  ;;  %v266_v36 = vld [vmem:[%s2542_s25 + $0xa] sm:$0xff] }
  0x21   : > { %v2696_v33 = vld [vmem:[%s2542_s25 + $0x169] sm:$0xff]  ;;  %v2721_v39 = vld [vmem:[%s2542_s25 + $0x3a] sm:$0xff]  ;;  %v2724_v40 = vld [vmem:[%s2542_s25 + $0x32] sm:$0xff] }
  0x22   : > { %v2704_v34 = vld [vmem:[%s2542_s25 + $0x22] sm:$0xff]  ;;  %v2718_v38 = vld [vmem:[%s2542_s25 + $0x4a] sm:$0xff]  ;;  %v2741_v44 = vld [vmem:[%s2542_s25 + $0x52] sm:$0xff] }
  0x23   : > { %v2735_v42 = vld [vmem:[%s2542_s25 + $0x6a] sm:$0xff]  ;;  %v2738_v43 = vld [vmem:[%s2542_s25 + $0x62] sm:$0xff]  ;;  %v2752_v46 = vld [vmem:[%s2542_s25 + $0x92] sm:$0xff] }
  0x24   : > { %v2755_v47 = vld [vmem:[%s2542_s25 + $0x82] sm:$0xff]  ;;  %v2758_v48 = vld [vmem:[%s2542_s25 + $0x7a] sm:$0xff]  ;;  %v2773_v52 = vld [vmem:[%s2542_s25 + $0xb2] sm:$0xff] }
  0x25   : > { %v2776_v53 = vld [vmem:[%s2542_s25 + $0xaa] sm:$0xff]  ;;  %v2779_v54 = vld [vmem:[%s2542_s25 + $0x9a] sm:$0xff]  ;;  %v2800_v60 = vld [vmem:[%s2542_s25 + $0xc2] sm:$0xff] }
  0x26   : > { %539 = vrot.lane.b32.xlu2 %v2572_v7, %s2493_s28  ;;  %537 = vrot.lane.b32.xlu1 %v2575_v8, %s2493_s28  ;;  %v2794_v58 = vld [vmem:[%s2542_s25 + $0xda] sm:$0xff]  ;;  %v2797_v59 = vld [vmem:[%s2542_s25 + $0xca] sm:$0xff] }
  0x27   : > { %535 = vrot.lane.b32.xlu0 %v2578_v9, %s2493_s28  ;;  %v2815_v0 = vld [vmem:[%s2542_s25 + $0xfa] sm:$0xff]  ;;  %v2818_v3 = vld [vmem:[%s2542_s25 + $0xf2] sm:$0xff]  ;;  %v2821_v6 = vld [vmem:[%s2542_s25 + $0xe2] sm:$0xff] }
  0x2e   : > { %545 = vrot.lane.b32.xlu2 %v2587_v10, %s2493_s28  ;;  %543 = vrot.lane.b32.xlu1 %v2590_v11, %s2493_s28 }
  0x2f   : > { %541 = vrot.lane.b32.xlu0 %v2593_v12, %s2493_s28 }
  0x36   : > { %551 = vrot.lane.b32.xlu2 %v2602_v13, %s2493_s28  ;;  %549 = vrot.lane.b32.xlu1 %v2605_v14, %s2493_s28 }
  0x37   : > { %547 = vrot.lane.b32.xlu0 %v2608_v15, %s2493_s28 }
  0x3e   : > { %557 = vrot.lane.b32.xlu2 %v2617_v16, %s2493_s28  ;;  %555 = vrot.lane.b32.xlu1 %v2620_v17, %s2493_s28 }
  0x3f   : > { %553 = vrot.lane.b32.xlu0 %v2623_v18, %s2493_s28 }
  0x46   : > { %563 = vrot.lane.b32.xlu2 %v2632_v19, %s2493_s28  ;;  %561 = vrot.lane.b32.xlu1 %v2635_v20, %s2493_s28 }
  0x47   : > { %559 = vrot.lane.b32.xlu0 %v2638_v21, %s2493_s28 }
  0x4e   : > { %569 = vrot.lane.b32.xlu2 %v2647_v22, %s2493_s28  ;;  %567 = vrot.lane.b32.xlu1 %v2650_v23, %s2493_s28 }
  0x4f   : > { %565 = vrot.lane.b32.xlu0 %v2653_v24, %s2493_s28 }
  0x56   : > { %575 = vrot.lane.b32.xlu2 %v2662_v25, %s2493_s28  ;;  %573 = vrot.lane.b32.xlu1 %v2665_v26, %s2493_s28 }
  0x57   : > { %571 = vrot.lane.b32.xlu0 %v2668_v27, %s2493_s28 }
  0x5e   : > { %581 = vrot.lane.b32.xlu2 %v2677_v28, %s2493_s28  ;;  %579 = vrot.lane.b32.xlu1 %v2680_v29, %s2493_s28 }
  0x5f   : > { %577 = vrot.lane.b32.xlu0 %v2683_v30, %s2493_s28 }
  0x66   : > { %651 = vrot.lane.b32.xlu2 %v265_v31, %s2494_s29  ;;  %585 = vrot.lane.b32.xlu1 %v2693_v32, %s2493_s28 }
  0x67   : > { %583 = vrot.lane.b32.xlu0 %v2696_v33, %s2493_s28 }
  0x6e   : > { %657 = vrot.lane.b32.xlu2 %v2704_v34, %s2494_s29  ;;  %655 = vrot.lane.b32.xlu1 %v2707_v35, %s2494_s29 }
  0x6f   : > { %653 = vrot.lane.b32.xlu0 %v266_v36, %s2494_s29 }
  0x70   : > { %v2715_v37 = vpop.permute.xlu2 %531 }
  0x71   : > { %4344 = vst [vmem:[#allocation2_spill] sm:$0xff] %v2715_v37  ;;  %v2842_v37 = vld [vmem:[%s2542_s25 + $0x10a] sm:$0xff] }
  0x76   : > { %663 = vrot.lane.b32.xlu2 %v2718_v38, %s2494_s29  ;;  %661 = vrot.lane.b32.xlu1 %v2721_v39, %s2494_s29 }
  0x77   : > { %659 = vrot.lane.b32.xlu0 %v2724_v40, %s2494_s29 }
  0x78   : > { %v2732_v41 = vpop.permute.xlu2 %533 }
  0x79   : > { %4345 = vst [vmem:[#allocation3_spill] sm:$0xff] %v2732_v41  ;;  %v2839_v41 = vld [vmem:[%s2542_s25 + $0x112] sm:$0xff] }
  0x7e   : > { %669 = vrot.lane.b32.xlu2 %v2735_v42, %s2494_s29  ;;  %667 = vrot.lane.b32.xlu1 %v2738_v43, %s2494_s29 }
  0x7f   : > { %665 = vrot.lane.b32.xlu0 %v2741_v44, %s2494_s29 }
  0x80   : > { %v2749_v45 = vpop.permute.xlu2 %539 }
  0x81   : > { %4346 = vst [vmem:[#allocation4_spill] sm:$0xff] %v2749_v45 }
  0x86   : > { %675 = vrot.lane.b32.xlu2 %v2752_v46, %s2494_s29  ;;  %673 = vrot.lane.b32.xlu1 %v2755_v47, %s2494_s29 }
  0x87   : > { %671 = vrot.lane.b32.xlu0 %v2758_v48, %s2494_s29 }
  0x88   : > { %v2766_v49 = vpop.permute.xlu2 %545  ;;  %v2768_v50 = vpop.permute.xlu1 %527 }
  0x89   : > { %4347 = vst [vmem:[#allocation5_spill] sm:$0xff] %v2766_v49  ;;  %v2770_v51 = vpop.permute.xlu0 %523  ;;  %v2836_v49 = vld [vmem:[%s2542_s25 + $0x122] sm:$0xff] }
  0x8a   : > { %4348 = vst [vmem:[#allocation6_spill] sm:$0xff] %v2768_v50  ;;  %v2884_v50 = vld [vmem:[%s2542_s25 + $0x152] sm:$0xff] }
  0x8b   : > { %4349 = vst [vmem:[#allocation7_spill] sm:$0xff] %v2770_v51 }
  0x8c   : > { %4368 = vst [vmem:[#allocation26_spill] sm:$0xff] %v2884_v50 }
  0x8e   : > { %681 = vrot.lane.b32.xlu2 %v2773_v52, %s2494_s29  ;;  %679 = vrot.lane.b32.xlu1 %v2776_v53, %s2494_s29 }
  0x8f   : > { %677 = vrot.lane.b32.xlu0 %v2779_v54, %s2494_s29 }
  0x90   : > { %v2787_v55 = vpop.permute.xlu2 %551  ;;  %v2789_v56 = vpop.permute.xlu1 %529 }
  0x91   : > { %4350 = vst [vmem:[#allocation8_spill] sm:$0xff] %v2787_v55  ;;  %v2791_v57 = vpop.permute.xlu0 %525  ;;  %v2863_v55 = vld [vmem:[%s2542_s25 + $0x12a] sm:$0xff] }
  0x92   : > { %4351 = vst [vmem:[#allocation9_spill] sm:$0xff] %v2789_v56 }
  0x93   : > { %4352 = vst [vmem:[#allocation10_spill] sm:$0xff] %v2791_v57 }
  0x96   : > { %687 = vrot.lane.b32.xlu2 %v2794_v58, %s2494_s29  ;;  %685 = vrot.lane.b32.xlu1 %v2797_v59, %s2494_s29 }
  0x97   : > { %683 = vrot.lane.b32.xlu0 %v2800_v60, %s2494_s29 }
  0x98   : > { %v2808_v61 = vpop.permute.xlu2 %557  ;;  %v2810_v62 = vpop.permute.xlu1 %537 }
  0x99   : > { %4353 = vst [vmem:[#allocation11_spill] sm:$0xff] %v2808_v61  ;;  %v2812_v63 = vpop.permute.xlu0 %535  ;;  %v2860_v61 = vld [vmem:[%s2542_s25 + $0x13a] sm:$0xff] }
  0x9a   : > { %4354 = vst [vmem:[#allocation12_spill] sm:$0xff] %v2810_v62  ;;  %v2881_v62 = vld [vmem:[%s2542_s25 + $0x15a] sm:$0xff] }
  0x9b   : > { %4355 = vst [vmem:[#allocation13_spill] sm:$0xff] %v2812_v63 }
  0x9c   : > { %4367 = vst [vmem:[#allocation25_spill] sm:$0xff] %v2881_v62 }
  0x9e   : > { %693 = vrot.lane.b32.xlu2 %v2815_v0, %s2494_s29  ;;  %691 = vrot.lane.b32.xlu1 %v2818_v3, %s2494_s29 }
  0x9f   : > { %689 = vrot.lane.b32.xlu0 %v2821_v6, %s2494_s29 }
  0xa0   : > { %v2829_v31 = vpop.permute.xlu2 %563  ;;  %v2831_v36 = vpop.permute.xlu1 %543 }
  0xa1   : > { %4356 = vst [vmem:[#allocation14_spill] sm:$0xff] %v2829_v31  ;;  %v2833_v63 = vpop.permute.xlu0 %541  ;;  %v2857_v31 = vld [vmem:[%s2542_s25 + $0x142] sm:$0xff] }
  0xa2   : > { %4357 = vst [vmem:[#allocation15_spill] sm:$0xff] %v2831_v36  ;;  %v2878_v36 = vld [vmem:[%s2542_s25 + $0x16a] sm:$0xff] }
  0xa3   : > { %4358 = vst [vmem:[#allocation16_spill] sm:$0xff] %v2833_v63 }
  0xa4   : > { %4362 = vst [vmem:[#allocation20_spill] sm:$0xff] %v2857_v31 }
  0xa5   : > { %4366 = vst [vmem:[#allocation24_spill] sm:$0xff] %v2878_v36 }
  0xa6   : > { %699 = vrot.lane.b32.xlu2 %v2836_v49, %s2494_s29  ;;  %697 = vrot.lane.b32.xlu1 %v2839_v41, %s2494_s29 }
  0xa7   : > { %695 = vrot.lane.b32.xlu0 %v2842_v37, %s2494_s29 }
  0xa8   : > { %v2850_v45 = vpop.permute.xlu2 %569  ;;  %v2852_v57 = vpop.permute.xlu1 %549 }
  0xa9   : > { %4359 = vst [vmem:[#allocation17_spill] sm:$0xff] %v2850_v45  ;;  %v2854_v51 = vpop.permute.xlu0 %547 }
  0xaa   : > { %4360 = vst [vmem:[#allocation18_spill] sm:$0xff] %v2852_v57 }
  0xab   : > { %4361 = vst [vmem:[#allocation19_spill] sm:$0xff] %v2854_v51 }
  0xae   : > { %705 = vrot.lane.b32.xlu2 %v2857_v31, %s2494_s29  ;;  %703 = vrot.lane.b32.xlu1 %v2860_v61, %s2494_s29  ;;  %v2899_v31 = vld [vmem:[%s2542_s25 + $0x172] sm:$0xff] }
  0xaf   : > { %701 = vrot.lane.b32.xlu0 %v2863_v55, %s2494_s29  ;;  %4372 = vst [vmem:[#allocation30_spill] sm:$0xff] %v2899_v31 }
  0xb0   : > { %v2871_v45 = vpop.permute.xlu2 %575  ;;  %v2873_v51 = vpop.permute.xlu1 %555 }
  0xb1   : > { %4363 = vst [vmem:[#allocation21_spill] sm:$0xff] %v2871_v45  ;;  %v2875_v57 = vpop.permute.xlu0 %553 }
  0xb2   : > { %4364 = vst [vmem:[#allocation22_spill] sm:$0xff] %v2873_v51  ;;  %v205_v51 = vld [vmem:[%s2542_s25 + $0x30] sm:$0xff] }
  0xb3   : > { %4365 = vst [vmem:[#allocation23_spill] sm:$0xff] %v2875_v57  ;;  %v2902_v57 = vld [vmem:[%s2542_s25 + $0x18] sm:$0xff] }
  0xb4   : > { %4373 = vst [vmem:[#allocation31_spill] sm:$0xff] %v2902_v57 }
  0xb6   : > { %711 = vrot.lane.b32.xlu2 %v2878_v36, %s2494_s29  ;;  %709 = vrot.lane.b32.xlu1 %v2881_v62, %s2494_s29  ;;  %v2905_v36 = vld [vmem:[%s2542_s25 + $0x20] sm:$0xff]  ;;  %v2921_v62 = vld [vmem:[%s2542_s25 + $0x48] sm:$0xff] }
  0xb7   : > { %707 = vrot.lane.b32.xlu0 %v2884_v50, %s2494_s29  ;;  %4374 = vst [vmem:[#allocation32_spill] sm:$0xff] %v2905_v36  ;;  %v206_v50 = vld [vmem:[%s2542_s25 + $0x38] sm:$0xff] }
  0xb8   : > { %v2892_v45 = vpop.permute.xlu2 %581  ;;  %v2894_v63 = vpop.permute.xlu1 %561  ;;  %4378 = vst [vmem:[#allocation36_spill] sm:$0xff] %v2921_v62 }
  0xb9   : > { %4369 = vst [vmem:[#allocation27_spill] sm:$0xff] %v2892_v45  ;;  %v2896_v56 = vpop.permute.xlu0 %559 }
  0xba   : > { %4370 = vst [vmem:[#allocation28_spill] sm:$0xff] %v2894_v63 }
  0xbb   : > { %4371 = vst [vmem:[#allocation29_spill] sm:$0xff] %v2896_v56 }
  0xbe   : > { %781 = vrot.lane.b32.xlu2 %v2905_v36, %s2495_s30  ;;  %779 = vrot.lane.b32.xlu1 %v2902_v57, %s2495_s30 }
  0xbf   : > { %713 = vrot.lane.b32.xlu0 %v2899_v31, %s2494_s29  ;;  %v2939_v31 = vld [vmem:[%s2542_s25 + $0x50] sm:$0xff] }
  0xc0   : > { %v2913_v45 = vpop.permute.xlu2 %651  ;;  %v2915_v56 = vpop.permute.xlu1 %567  ;;  %4383 = vst [vmem:[#allocation41_spill] sm:$0xff] %v2939_v31 }
  0xc1   : > { %4375 = vst [vmem:[#allocation33_spill] sm:$0xff] %v2913_v45  ;;  %v2917_v63 = vpop.permute.xlu0 %565 }
  0xc2   : > { %4376 = vst [vmem:[#allocation34_spill] sm:$0xff] %v2915_v56  ;;  %v2936_v56 = vld [vmem:[%s2542_s25 + $0x68] sm:$0xff] }
  0xc3   : > { %4377 = vst [vmem:[#allocation35_spill] sm:$0xff] %v2917_v63  ;;  %v209_v63 = vld [vmem:[%s2542_s25 + $0x60] sm:$0xff] }
  0xc4   : > { %4382 = vst [vmem:[#allocation40_spill] sm:$0xff] %v2936_v56 }
  0xc6   : > { %787 = vrot.lane.b32.xlu2 %v2921_v62, %s2495_s30  ;;  %785 = vrot.lane.b32.xlu1 %v206_v50, %s2495_s30 }
  0xc7   : > { %783 = vrot.lane.b32.xlu0 %v205_v51, %s2495_s30 }
  0xc8   : > { %v2928_v57 = vpop.permute.xlu2 %657  ;;  %v2930_v45 = vpop.permute.xlu1 %573 }
  0xc9   : > { %4379 = vst [vmem:[#allocation37_spill] sm:$0xff] %v2928_v57  ;;  %v2932_v36 = vpop.permute.xlu0 %571  ;;  %v2957_v57 = vld [vmem:[%s2542_s25 + $0x78] sm:$0xff] }
  0xca   : > { %4380 = vst [vmem:[#allocation38_spill] sm:$0xff] %v2930_v45  ;;  %v2954_v45 = vld [vmem:[%s2542_s25 + $0x90] sm:$0xff] }
  0xcb   : > { %4381 = vst [vmem:[#allocation39_spill] sm:$0xff] %v2932_v36  ;;  %v212_v36 = vld [vmem:[%s2542_s25 + $0x80] sm:$0xff] }
  0xcc   : > { %4387 = vst [vmem:[#allocation45_spill] sm:$0xff] %v2954_v45 }
  0xcd   : > { %4388 = vst [vmem:[#allocation46_spill] sm:$0xff] %v2957_v57 }
  0xce   : > { %793 = vrot.lane.b32.xlu2 %v2936_v56, %s2495_s30  ;;  %791 = vrot.lane.b32.xlu1 %v209_v63, %s2495_s30  ;;  %v2974_v56 = vld [vmem:[%s2542_s25 + $0xb0] sm:$0xff] }
  0xcf   : > { %789 = vrot.lane.b32.xlu0 %v2939_v31, %s2495_s30  ;;  %v2971_v31 = vld [vmem:[%s2542_s25 + $0xa8] sm:$0xff]  ;;  %4393 = vst [vmem:[#allocation51_spill] sm:$0xff] %v2974_v56 }
  0xd0   : > { %v2946_v50 = vpop.permute.xlu2 %663  ;;  %v2948_v51 = vpop.permute.xlu1 %579  ;;  %4392 = vst [vmem:[#allocation50_spill] sm:$0xff] %v2971_v31 }
  0xd1   : > { %4384 = vst [vmem:[#allocation42_spill] sm:$0xff] %v2946_v50  ;;  %v2950_v62 = vpop.permute.xlu0 %577 }
  0xd2   : > { %4385 = vst [vmem:[#allocation43_spill] sm:$0xff] %v2948_v51 }
  0xd3   : > { %4386 = vst [vmem:[#allocation44_spill] sm:$0xff] %v2950_v62  ;;  %v2977_v62 = vld [vmem:[%s2542_s25 + $0x98] sm:$0xff] }
  0xd4   : > { %4394 = vst [vmem:[#allocation52_spill] sm:$0xff] %v2977_v62 }
  0xd6   : > { %799 = vrot.lane.b32.xlu2 %v2954_v45, %s2495_s30  ;;  %797 = vrot.lane.b32.xlu1 %v212_v36, %s2495_s30  ;;  %v2998_v45 = vld [vmem:[%s2542_s25 + $0xc0] sm:$0xff] }
  0xd7   : > { %795 = vrot.lane.b32.xlu0 %v2957_v57, %s2495_s30  ;;  %4400 = vst [vmem:[#allocation58_spill] sm:$0xff] %v2998_v45 }
  0xd8   : > { %v2964_v63 = vpop.permute.xlu2 %669  ;;  %v2966_v50 = vpop.permute.xlu1 %585 }
  0xd9   : > { %4389 = vst [vmem:[#allocation47_spill] sm:$0xff] %v2964_v63  ;;  %v2968_v51 = vpop.permute.xlu0 %583  ;;  %v2995_v63 = vld [vmem:[%s2542_s25 + $0xd8] sm:$0xff] }
  0xda   : > { %4390 = vst [vmem:[#allocation48_spill] sm:$0xff] %v2966_v50  ;;  %v2992_v50 = vld [vmem:[%s2542_s25 + $0xc8] sm:$0xff] }
  0xdb   : > { %4391 = vst [vmem:[#allocation49_spill] sm:$0xff] %v2968_v51 }
  0xdc   : > { %4398 = vst [vmem:[#allocation56_spill] sm:$0xff] %v2992_v50 }
  0xdd   : > { %4399 = vst [vmem:[#allocation57_spill] sm:$0xff] %v2995_v63 }
  0xde   : > { %805 = vrot.lane.b32.xlu2 %v2974_v56, %s2495_s30  ;;  %803 = vrot.lane.b32.xlu1 %v2971_v31, %s2495_s30  ;;  %v3019_v56 = vld [vmem:[%s2542_s25 + $0xe0] sm:$0xff] }
  0xdf   : > { %801 = vrot.lane.b32.xlu0 %v2977_v62, %s2495_s30  ;;  %v3013_v62 = vld [vmem:[%s2542_s25 + $0xf0] sm:$0xff]  ;;  %4406 = vst [vmem:[#allocation64_spill] sm:$0xff] %v3019_v56 }
  0xe0   : > { %v2985_v36 = vpop.permute.xlu2 %675  ;;  %v2987_v57 = vpop.permute.xlu1 %655  ;;  %4404 = vst [vmem:[#allocation62_spill] sm:$0xff] %v3013_v62 }
  0xe1   : > { %4395 = vst [vmem:[#allocation53_spill] sm:$0xff] %v2985_v36  ;;  %v2989_v51 = vpop.permute.xlu0 %653 }
  0xe2   : > { %4396 = vst [vmem:[#allocation54_spill] sm:$0xff] %v2987_v57  ;;  %v3016_v57 = vld [vmem:[%s2542_s25 + $0xf8] sm:$0xff] }
  0xe3   : > { %4397 = vst [vmem:[#allocation55_spill] sm:$0xff] %v2989_v51 }
  0xe4   : > { %4405 = vst [vmem:[#allocation63_spill] sm:$0xff] %v3016_v57 }
  0xe6   : > { %811 = vrot.lane.b32.xlu2 %v2995_v63, %s2495_s30  ;;  %809 = vrot.lane.b32.xlu1 %v2992_v50, %s2495_s30  ;;  %v3034_v63 = vld [vmem:[%s2542_s25 + $0x110] sm:$0xff] }
  0xe7   : > { %807 = vrot.lane.b32.xlu0 %v2998_v45, %s2495_s30  ;;  %4410 = vst [vmem:[#allocation68_spill] sm:$0xff] %v3034_v63  ;;  %v3040_v45 = vld [vmem:[%s2542_s25 + $0x108] sm:$0xff] }
  0xe8   : > { %v3006_v36 = vpop.permute.xlu2 %681  ;;  %v3008_v51 = vpop.permute.xlu1 %661  ;;  %4412 = vst [vmem:[#allocation70_spill] sm:$0xff] %v3040_v45 }
  0xe9   : > { %4401 = vst [vmem:[#allocation59_spill] sm:$0xff] %v3006_v36  ;;  %v3010_v31 = vpop.permute.xlu0 %659  ;;  %v3037_v36 = vld [vmem:[%s2542_s25 + $0x120] sm:$0xff] }
  0xea   : > { %4402 = vst [vmem:[#allocation60_spill] sm:$0xff] %v3008_v51 }
  0xeb   : > { %4403 = vst [vmem:[#allocation61_spill] sm:$0xff] %v3010_v31 }
  0xec   : > { %4411 = vst [vmem:[#allocation69_spill] sm:$0xff] %v3037_v36 }
  0xee   : > { %817 = vrot.lane.b32.xlu2 %v3016_v57, %s2495_s30  ;;  %815 = vrot.lane.b32.xlu1 %v3013_v62, %s2495_s30 }
  0xef   : > { %813 = vrot.lane.b32.xlu0 %v3019_v56, %s2495_s30  ;;  %v3061_v56 = vld [vmem:[%s2542_s25 + $0x128] sm:$0xff] }
  0xf0   : > { %v3027_v51 = vpop.permute.xlu2 %687  ;;  %v3029_v31 = vpop.permute.xlu1 %667  ;;  %4418 = vst [vmem:[#allocation76_spill] sm:$0xff] %v3061_v56 }
  0xf1   : > { %4407 = vst [vmem:[#allocation65_spill] sm:$0xff] %v3027_v51  ;;  %v3031_v50 = vpop.permute.xlu0 %665  ;;  %v3058_v51 = vld [vmem:[%s2542_s25 + $0x140] sm:$0xff] }
  0xf2   : > { %4408 = vst [vmem:[#allocation66_spill] sm:$0xff] %v3029_v31 }
  0xf3   : > { %4409 = vst [vmem:[#allocation67_spill] sm:$0xff] %v3031_v50  ;;  %v3055_v50 = vld [vmem:[%s2542_s25 + $0x138] sm:$0xff] }
  0xf4   : > { %4416 = vst [vmem:[#allocation74_spill] sm:$0xff] %v3055_v50 }
  0xf5   : > { %4417 = vst [vmem:[#allocation75_spill] sm:$0xff] %v3058_v51 }
  0xf6   : > { %823 = vrot.lane.b32.xlu2 %v3037_v36, %s2495_s30  ;;  %821 = vrot.lane.b32.xlu1 %v3034_v63, %s2495_s30  ;;  %v3079_v36 = vld [vmem:[%s2542_s25 + $0x168] sm:$0xff] }
  0xf7   : > { %819 = vrot.lane.b32.xlu0 %v3040_v45, %s2495_s30  ;;  %4423 = vst [vmem:[#allocation81_spill] sm:$0xff] %v3079_v36  ;;  %v3082_v45 = vld [vmem:[%s2542_s25 + $0x150] sm:$0xff] }
  0xf8   : > { %v3048_v31 = vpop.permute.xlu2 %693  ;;  %v3050_v62 = vpop.permute.xlu1 %673  ;;  %4424 = vst [vmem:[#allocation82_spill] sm:$0xff] %v3082_v45 }
  0xf9   : > { %4413 = vst [vmem:[#allocation71_spill] sm:$0xff] %v3048_v31  ;;  %v3052_v57 = vpop.permute.xlu0 %671  ;;  %v3076_v31 = vld [vmem:[%s2542_s25 + $0x158] sm:$0xff] }
  0xfa   : > { %4414 = vst [vmem:[#allocation72_spill] sm:$0xff] %v3050_v62 }
  0xfb   : > { %4415 = vst [vmem:[#allocation73_spill] sm:$0xff] %v3052_v57 }
  0xfc   : > { %4422 = vst [vmem:[#allocation80_spill] sm:$0xff] %v3076_v31 }
  0xfe   : > { %829 = vrot.lane.b32.xlu2 %v3058_v51, %s2495_s30  ;;  %827 = vrot.lane.b32.xlu1 %v3055_v50, %s2495_s30  ;;  %v2246_v51 = vld [vmem:[%s2542_s25 + $0x188] sm:$0xff] }
  0xff   : > { %825 = vrot.lane.b32.xlu0 %v3061_v56, %s2495_s30  ;;  %v3099_v56 = vld [vmem:[%s2542_s25 + $0x170] sm:$0xff] }
 0x100   : > { %v3069_v62 = vpop.permute.xlu2 %699  ;;  %v3071_v63 = vpop.permute.xlu1 %679 }
 0x101   : > { %4419 = vst [vmem:[#allocation77_spill] sm:$0xff] %v3069_v62  ;;  %v3073_v57 = vpop.permute.xlu0 %677  ;;  %v2245_v62 = vld [vmem:[%s2542_s25 + $0x180] sm:$0xff] }
 0x102   : > { %4420 = vst [vmem:[#allocation78_spill] sm:$0xff] %v3071_v63 }
 0x103   : > { %4421 = vst [vmem:[#allocation79_spill] sm:$0xff] %v3073_v57 }
 0x106   : > { %835 = vrot.lane.b32.xlu2 %v3079_v36, %s2495_s30  ;;  %833 = vrot.lane.b32.xlu1 %v3076_v31, %s2495_s30 }
 0x107   : > { %831 = vrot.lane.b32.xlu0 %v3082_v45, %s2495_s30 }
 0x108   : > { %v3090_v50 = vpop.permute.xlu2 %705  ;;  %v3092_v63 = vpop.permute.xlu1 %685 }
 0x109   : > { %4425 = vst [vmem:[#allocation83_spill] sm:$0xff] %v3092_v63  ;;  %v3094_v57 = vpop.permute.xlu0 %683 }
 0x10e   : > { %841 = vrot.lane.b32.xlu2 %v2246_v51, %s2495_s30  ;;  %839 = vrot.lane.b32.xlu1 %v2245_v62, %s2495_s30 }
 0x10f   : > { %837 = vrot.lane.b32.xlu0 %v3099_v56, %s2495_s30 }
 0x110   : > { %v3105_v31 = vpop.permute.xlu2 %711  ;;  %v3107_v45 = vpop.permute.xlu1 %691 }
 0x111   : > { %v3109_v36 = vpop.permute.xlu0 %689 }
 0x116   : > { %911 = vrot.lane.b32.xlu2 %v2548_v1, %s2496_s5  ;;  %909 = vrot.lane.b32.xlu1 %v2563_v5, %s2496_s5 }
 0x117   : > { %907 = vrot.lane.b32.xlu0 %v2551_v2, %s2496_s5 }
 0x118   : > { %v3117_v62 = vpop.permute.xlu2 %781  ;;  %v3119_v51 = vpop.permute.xlu1 %697 }
 0x119   : > { %4426 = vst [vmem:[#allocation84_spill] sm:$0xff] %v3117_v62  ;;  %v3121_v63 = vpop.permute.xlu0 %695 }
 0x11e   : > { %917 = vrot.lane.b32.xlu2 %v2575_v8, %s2496_s5  ;;  %915 = vrot.lane.b32.xlu1 %v2578_v9, %s2496_s5 }
 0x11f   : > { %913 = vrot.lane.b32.xlu0 %v2560_v4, %s2496_s5 }
 0x120   : > { %v3129_v1 = vpop.permute.xlu2 %787  ;;  %v3131_v5 = vpop.permute.xlu1 %703 }
 0x121   : > { %4427 = vst [vmem:[#allocation85_spill] sm:$0xff] %v3129_v1  ;;  %v3133_v2 = vpop.permute.xlu0 %701 }
 0x126   : > { %923 = vrot.lane.b32.xlu2 %v2590_v11, %s2496_s5  ;;  %921 = vrot.lane.b32.xlu1 %v2593_v12, %s2496_s5 }
 0x127   : > { %919 = vrot.lane.b32.xlu0 %v2572_v7, %s2496_s5 }
 0x128   : > { %v3141_v8 = vpop.permute.xlu2 %793  ;;  %v3143_v9 = vpop.permute.xlu1 %709 }
 0x129   : > { %v3145_v4 = vpop.permute.xlu0 %707 }
 0x12e   : > { %929 = vrot.lane.b32.xlu2 %v2605_v14, %s2496_s5  ;;  %927 = vrot.lane.b32.xlu1 %v2608_v15, %s2496_s5 }
 0x12f   : > { %925 = vrot.lane.b32.xlu0 %v2587_v10, %s2496_s5 }
 0x130   : > { %v3153_v11 = vpop.permute.xlu2 %799  ;;  %v3155_v12 = vpop.permute.xlu1 %779 }
 0x131   : > { %v3157_v7 = vpop.permute.xlu0 %713 }
 0x136   : > { %935 = vrot.lane.b32.xlu2 %v2620_v17, %s2496_s5  ;;  %933 = vrot.lane.b32.xlu1 %v2623_v18, %s2496_s5 }
 0x137   : > { %931 = vrot.lane.b32.xlu0 %v2602_v13, %s2496_s5 }
 0x138   : > { %v3165_v14 = vpop.permute.xlu2 %805  ;;  %v3167_v15 = vpop.permute.xlu1 %785 }
 0x139   : > { %v3169_v10 = vpop.permute.xlu0 %783 }
 0x13e   : > { %941 = vrot.lane.b32.xlu2 %v2635_v20, %s2496_s5  ;;  %939 = vrot.lane.b32.xlu1 %v2638_v21, %s2496_s5 }
 0x13f   : > { %937 = vrot.lane.b32.xlu0 %v2617_v16, %s2496_s5 }
 0x140   : > { %v3177_v17 = vpop.permute.xlu2 %811  ;;  %v3179_v18 = vpop.permute.xlu1 %791 }
 0x141   : > { %4428 = vst [vmem:[#allocation86_spill] sm:$0xff] %v3179_v18  ;;  %v3181_v13 = vpop.permute.xlu0 %789  ;;  %v2277_v18 = vld [vmem:[%s2542_s25 + $0x181] sm:$0xff] }
 0x142   : > { %4429 = vst [vmem:[#allocation87_spill] sm:$0xff] %v3181_v13 }
 0x146   : > { %947 = vrot.lane.b32.xlu2 %v2650_v23, %s2496_s5  ;;  %945 = vrot.lane.b32.xlu1 %v2653_v24, %s2496_s5 }
 0x147   : > { %943 = vrot.lane.b32.xlu0 %v2632_v19, %s2496_s5 }
 0x148   : > { %v3189_v20 = vpop.permute.xlu2 %817  ;;  %v3191_v21 = vpop.permute.xlu1 %797 }
 0x149   : > { %v3193_v16 = vpop.permute.xlu0 %795 }
 0x14a   : > { %4430 = vst [vmem:[#allocation88_spill] sm:$0xff] %v3193_v16  ;;  %v4460_v16 = vld [vmem:[#allocation32_spill] sm:$0xff] }
 0x14e   : > { %953 = vrot.lane.b32.xlu2 %v2665_v26, %s2496_s5  ;;  %951 = vrot.lane.b32.xlu1 %v2668_v27, %s2496_s5 }
 0x14f   : > { %949 = vrot.lane.b32.xlu0 %v2647_v22, %s2496_s5 }
 0x150   : > { %v3201_v23 = vpop.permute.xlu2 %823  ;;  %v3203_v19 = vpop.permute.xlu1 %803 }
 0x151   : > { %4431 = vst [vmem:[#allocation89_spill] sm:$0xff] %v3203_v19  ;;  %v3205_v24 = vpop.permute.xlu0 %801  ;;  %v2278_v19 = vld [vmem:[%s2542_s25 + $0x189] sm:$0xff] }
 0x152   : > { %4432 = vst [vmem:[#allocation90_spill] sm:$0xff] %v3205_v24  ;;  %v4445_v24 = vld [vmem:[#allocation51_spill] sm:$0xff] }
 0x156   : > { %959 = vrot.lane.b32.xlu2 %v2680_v29, %s2496_s5  ;;  %957 = vrot.lane.b32.xlu1 %v2683_v30, %s2496_s5 }
 0x157   : > { %955 = vrot.lane.b32.xlu0 %v2662_v25, %s2496_s5 }
 0x158   : > { %v3213_v26 = vpop.permute.xlu2 %829  ;;  %v3215_v22 = vpop.permute.xlu1 %809 }
 0x159   : > { %v3217_v27 = vpop.permute.xlu0 %807 }
 0x15e   : > { %965 = vrot.lane.b32.xlu2 %v2693_v32, %s2496_s5  ;;  %963 = vrot.lane.b32.xlu1 %v2696_v33, %s2496_s5 }
 0x15f   : > { %961 = vrot.lane.b32.xlu0 %v2677_v28, %s2496_s5 }
 0x160   : > { %v3225_v29 = vpop.permute.xlu2 %835  ;;  %v3227_v30 = vpop.permute.xlu1 %815 }
 0x161   : > { %v3229_v25 = vpop.permute.xlu0 %813 }
 0x166   : > { %1035 = vrot.lane.b32.xlu2 %v2707_v35, %s2497_s6  ;;  %969 = vrot.lane.b32.xlu1 %v2278_v19, %s2496_s5 }
 0x167   : > { %967 = vrot.lane.b32.xlu0 %v2277_v18, %s2496_s5 }
 0x168   : > { %v3237_v32 = vpop.permute.xlu2 %841  ;;  %v3239_v33 = vpop.permute.xlu1 %821 }
 0x169   : > { %v3241_v28 = vpop.permute.xlu0 %819 }
 0x16e   : > { %1041 = vrot.lane.b32.xlu2 %v2721_v39, %s2497_s6  ;;  %1039 = vrot.lane.b32.xlu1 %v2724_v40, %s2497_s6 }
 0x16f   : > { %1037 = vrot.lane.b32.xlu0 %v2704_v34, %s2497_s6 }
 0x170   : > { %v3249_v35 = vpop.permute.xlu2 %911  ;;  %v3251_v19 = vpop.permute.xlu1 %827 }
 0x171   : > { %v3253_v18 = vpop.permute.xlu0 %825 }
 0x176   : > { %1047 = vrot.lane.b32.xlu2 %v2738_v43, %s2497_s6  ;;  %1045 = vrot.lane.b32.xlu1 %v2741_v44, %s2497_s6 }
 0x177   : > { %1043 = vrot.lane.b32.xlu0 %v2718_v38, %s2497_s6 }
 0x178   : > { %v3261_v39 = vpop.permute.xlu2 %917  ;;  %v3263_v40 = vpop.permute.xlu1 %833 }
 0x179   : > { %4433 = vst [vmem:[#allocation91_spill] sm:$0xff] %v3261_v39  ;;  %v3265_v34 = vpop.permute.xlu0 %831 }
 0x17e   : > { %1053 = vrot.lane.b32.xlu2 %v2755_v47, %s2497_s6  ;;  %1051 = vrot.lane.b32.xlu1 %v2758_v48, %s2497_s6 }
 0x17f   : > { %1049 = vrot.lane.b32.xlu0 %v2735_v42, %s2497_s6 }
 0x180   : > { %v3273_v43 = vpop.permute.xlu2 %923  ;;  %v3275_v44 = vpop.permute.xlu1 %839 }
 0x181   : > { %4434 = vst [vmem:[#allocation92_spill] sm:$0xff] %v3273_v43  ;;  %v3277_v38 = vpop.permute.xlu0 %837 }
 0x186   : > { %1059 = vrot.lane.b32.xlu2 %v2776_v53, %s2497_s6  ;;  %1057 = vrot.lane.b32.xlu1 %v2779_v54, %s2497_s6 }
 0x187   : > { %1055 = vrot.lane.b32.xlu0 %v2752_v46, %s2497_s6 }
 0x188   : > { %v3285_v47 = vpop.permute.xlu2 %929  ;;  %v3287_v48 = vpop.permute.xlu1 %909 }
 0x189   : > { %4435 = vst [vmem:[#allocation93_spill] sm:$0xff] %v3285_v47  ;;  %v3289_v42 = vpop.permute.xlu0 %907  ;;  %v4441_v47 = vld [vmem:[#allocation58_spill] sm:$0xff] }
 0x18a   : > { %4436 = vst [vmem:[#allocation94_spill] sm:$0xff] %v3287_v48  ;;  %v4462_v48 = vld [vmem:[#allocation38_spill] sm:$0xff] }
 0x18e   : > { %1065 = vrot.lane.b32.xlu2 %v2797_v59, %s2497_s6  ;;  %1063 = vrot.lane.b32.xlu1 %v2800_v60, %s2497_s6 }
 0x18f   : > { %1061 = vrot.lane.b32.xlu0 %v2773_v52, %s2497_s6 }
 0x190   : > { %v3297_v53 = vpop.permute.xlu2 %935  ;;  %v3299_v54 = vpop.permute.xlu1 %915 }
 0x191   : > { %4437 = vst [vmem:[#allocation95_spill] sm:$0xff] %v3299_v54  ;;  %v3301_v46 = vpop.permute.xlu0 %913  ;;  %v4446_v54 = vld [vmem:[#allocation20_spill] sm:$0xff] }
 0x196   : > { %1071 = vrot.lane.b32.xlu2 %v2818_v3, %s2497_s6  ;;  %1069 = vrot.lane.b32.xlu1 %v2821_v6, %s2497_s6 }
 0x197   : > { %1067 = vrot.lane.b32.xlu0 %v2794_v58, %s2497_s6 }
 0x198   : > { %v3309_v59 = vpop.permute.xlu2 %941  ;;  %v3311_v60 = vpop.permute.xlu1 %921 }
 0x199   : > { %v3313_v52 = vpop.permute.xlu0 %919 }
 0x19a   : > { %4438 = vst [vmem:[#allocation96_spill] sm:$0xff] %v3313_v52  ;;  %v4440_v52 = vld [vmem:[#allocation22_spill] sm:$0xff] }
 0x19b   : > { %v1532_v39 = vsel %vm1515_vm0, %v4441_v47, %v4440_v52  ;;  %v4447_v47 = vld [vmem:[#allocation59_spill] sm:$0xff] }
 0x19e   : > { %1077 = vrot.lane.b32.xlu2 %v2839_v41, %s2497_s6  ;;  %1075 = vrot.lane.b32.xlu1 %v2842_v37, %s2497_s6 }
 0x19f   : > { %1073 = vrot.lane.b32.xlu0 %v2815_v0, %s2497_s6 }
 0x1a0   : > { %v3321_v3 = vpop.permute.xlu2 %947  ;;  %v3323_v6 = vpop.permute.xlu1 %927 }
 0x1a1   : > { %v3325_v58 = vpop.permute.xlu0 %925 }
 0x1a6   : > { %1083 = vrot.lane.b32.xlu2 %v2860_v61, %s2497_s6  ;;  %1081 = vrot.lane.b32.xlu1 %v2863_v55, %s2497_s6  ;;  %v4442_v61 = vld [vmem:[#allocation25_spill] sm:$0xff]  ;;  %v4443_v55 = vld [vmem:[#allocation26_spill] sm:$0xff] }
 0x1a7   : > { %1079 = vrot.lane.b32.xlu0 %v2836_v49, %s2497_s6  ;;  %v4444_v49 = vld [vmem:[#allocation23_spill] sm:$0xff] }
 0x1a8   : > { %v3333_v41 = vpop.permute.xlu2 %953  ;;  %v3335_v37 = vpop.permute.xlu1 %933  ;;  %v1531_v13 = vsel %vm1515_vm0, %v4445_v24, %v4444_v49 }
 0x1a9   : > { %v3337_v0 = vpop.permute.xlu0 %931  ;;  %v1564_v52 = vsel %vm1548_vm1, %v1531_v13, %v4447_v47  ;;  %v4449_v13 = vld [vmem:[#allocation28_spill] sm:$0xff] }
 0x1aa   : > { %4439 = vst [vmem:[#allocation97_spill] sm:$0xff] %v3337_v0  ;;  %v1565_v0 = vsel %vm1548_vm1, %v1532_v39, %v3094_v57  ;;  %v1597_v24 = vsel %vm1581_vm2, %v1564_v52, %v3215_v22  ;;  %v4450_v47 = vld [vmem:[#allocation64_spill] sm:$0xff]  ;;  %v4451_v22 = vld [vmem:[#allocation30_spill] sm:$0xff]  ;;  %v4453_v52 = vld [vmem:[#allocation57_spill] sm:$0xff] }
 0x1ae   : > { %1089 = vrot.lane.b32.xlu2 %v4442_v61, %s2497_s6  ;;  %1087 = vrot.lane.b32.xlu1 %v4443_v55, %s2497_s6  ;;  %v1598_v61 = vsel %vm1581_vm2, %v1565_v0, %v3177_v17  ;;  %v1535_v17 = vsel %vm1515_vm0, %v4450_v47, %v4449_v13  ;;  %v4452_v0 = vld [vmem:[#allocation29_spill] sm:$0xff] }
 0x1af   : > { %1085 = vrot.lane.b32.xlu0 %v4446_v54, %s2497_s6  ;;  %v3368_v54 = vld [vmem:[%s2542_s25 + $0x182] sm:$0xff] }
 0x1b0   : > { %v3357_v1 = vpop.permute.xlu2 %959  ;;  %v940_v55 = vpop.permute.xlu1 %939  ;;  %4448 = vst [vmem:[#allocation22_spill] sm:$0xff] %v3368_v54 }
 0x1b1   : > { %v3362_v49 = vsel %vm1614_vm3, %v1598_v61, %v940_v55  ;;  %v938_v57 = vpop.permute.xlu0 %937  ;;  %v1534_v61 = vsel %vm1515_vm0, %v4453_v52, %v4452_v0  ;;  %v1568_v55 = vsel %vm1548_vm1, %v1535_v17, %v3109_v36  ;;  %v2375_v17 = vld [vmem:[%s2542_s25 + $0x32] sm:$0xff] }
 0x1b2   : > { %v3365_v39 = vsel %vm1614_vm3, %v1597_v24, %v938_v57  ;;  %v4454_v24 = vld [vmem:[#allocation24_spill] sm:$0xff]  ;;  %v4455_v57 = vld [vmem:[#allocation65_spill] sm:$0xff]  ;;  %v1601_v47 = vsel %vm1581_vm2, %v1568_v55, %v3189_v20  ;;  %v4457_v20 = vld [vmem:[#allocation70_spill] sm:$0xff] }
 0x1b3   : > { %v1567_v13 = vsel %vm1548_vm1, %v1534_v61, %v4455_v57  ;;  %v2311_v61 = vld [vmem:[%s2542_s25 + $0x30] sm:$0xff]  ;;  %v4456_v57 = vld [vmem:[#allocation34_spill] sm:$0xff] }
 0x1b4   : > { %v1538_v55 = vsel %vm1515_vm0, %v4457_v20, %v4456_v57  ;;  %v2344_v57 = vld [vmem:[%s2542_s25 + $0x39] sm:$0xff] }
 0x1b5   : > { %v4459_v20 = vld [vmem:[#allocation9_spill] sm:$0xff] }
 0x1b6   : > { %1095 = vrot.lane.b32.xlu2 %v3368_v54, %s2497_s6  ;;  %1093 = vrot.lane.b32.xlu1 %v4451_v22, %s2497_s6  ;;  %v1600_v22 = vsel %vm1581_vm2, %v1567_v13, %v3227_v30  ;;  %v1571_v30 = vsel %vm1548_vm1, %v1538_v55, %v3121_v63  ;;  %v1519_v63 = vsel %vm1515_vm0, %v4460_v16, %v4459_v20  ;;  %v4461_v55 = vld [vmem:[#allocation37_spill] sm:$0xff] }
 0x1b7   : > { %1091 = vrot.lane.b32.xlu0 %v4454_v24, %s2497_s6  ;;  %v2343_v24 = vld [vmem:[%s2542_s25 + $0x31] sm:$0xff] }
 0x1b8   : > { %v3388_v54 = vpop.permute.xlu2 %965  ;;  %v946_v43 = vpop.permute.xlu1 %945  ;;  %v4466_v20 = vld [vmem:[#allocation77_spill] sm:$0xff] }
 0x1b9   : > { %v3393_v0 = vsel %vm1614_vm3, %v1601_v47, %v946_v43  ;;  %v944_v52 = vpop.permute.xlu0 %943  ;;  %v1604_v43 = vsel %vm1581_vm2, %v1571_v30, %v3201_v23  ;;  %v4463_v23 = vld [vmem:[#allocation76_spill] sm:$0xff] }
 0x1ba   : > { %v3396_v36 = vsel %vm1614_vm3, %v1600_v22, %v944_v52  ;;  %v1541_v30 = vsel %vm1515_vm0, %v4463_v23, %v4462_v48 }
 0x1be   : > { %1419 = vrot.lane.b32.xlu2 %v2375_v17, %s2498_s7  ;;  %1291 = vrot.lane.b32.xlu1 %v2343_v24, %s2499_s8  ;;  %v2376_v17 = vld [vmem:[%s2542_s25 + $0x3a] sm:$0xff] }
 0x1bf   : > { %1163 = vrot.lane.b32.xlu0 %v2311_v61, %s2500_s9  ;;  %v2312_v24 = vld [vmem:[%s2542_s25 + $0x38] sm:$0xff]  ;;  %v1552_v61 = vsel %vm1548_vm1, %v1519_v63, %v4461_v55 }
 0x1c0   : > { %v3411_v13 = vpop.permute.xlu2 %1035  ;;  %v952_v47 = vpop.permute.xlu1 %951  ;;  %v1585_v16 = vsel %vm1581_vm2, %v1552_v61, %v3167_v15  ;;  %v4469_v61 = vld [vmem:[#allocation75_spill] sm:$0xff] }
 0x1c1   : > { %4458 = vst [vmem:[#allocation58_spill] sm:$0xff] %v3411_v13  ;;  %v3414_v22 = vsel %vm1614_vm3, %v1604_v43, %v952_v47  ;;  %v3416_v52 = vpop.permute.xlu0 %949  ;;  %v4464_v43 = vld [vmem:[#allocation39_spill] sm:$0xff]  ;;  %v4465_v47 = vld [vmem:[#allocation69_spill] sm:$0xff]  ;;  %v1574_v13 = vsel %vm1548_vm1, %v1541_v30, %v3133_v2  ;;  %v4470_v30 = vld [vmem:[#allocation36_spill] sm:$0xff] }
 0x1c2   : > { %v1540_v62 = vsel %vm1515_vm0, %v4465_v47, %v4464_v43 }
 0x1c3   : > { %v1573_v48 = vsel %vm1548_vm1, %v1540_v62, %v4466_v20 }
 0x1c4   : > { %v1606_v2 = vsel %vm1581_vm2, %v1573_v48, %v3251_v19  ;;  %v4468_v19 = vld [vmem:[#allocation44_spill] sm:$0xff] }
 0x1c5   : > { %v1543_v23 = vsel %vm1515_vm0, %v4469_v61, %v4468_v19  ;;  %v4474_v19 = vld [vmem:[#allocation48_spill] sm:$0xff] }
 0x1c6   : > { %1421 = vrot.lane.b32.xlu2 %v2376_v17, %s2498_s7  ;;  %1293 = vrot.lane.b32.xlu1 %v2344_v57, %s2499_s8  ;;  %v1607_v17 = vsel %vm1581_vm2, %v1574_v13, %v3213_v26  ;;  %v1618_v57 = vsel %vm1614_vm3, %v1585_v16, %v3301_v46  ;;  %v2345_v46 = vld [vmem:[%s2542_s25 + $0x49] sm:$0xff]  ;;  %v4467_v13 = vld [vmem:[#allocation45_spill] sm:$0xff]  ;;  %v1576_v43 = vsel %vm1548_vm1, %v1543_v23, %v3090_v50 }
 0x1c7   : > { %1165 = vrot.lane.b32.xlu0 %v2312_v24, %s2500_s9  ;;  %v1609_v20 = vsel %vm1581_vm2, %v1576_v43, %v3263_v40  ;;  %v1547_v61 = vsel %vm1515_vm0, %v3099_v56, %v4474_v19  ;;  %v4475_v40 = vld [vmem:[#allocation49_spill] sm:$0xff] }
 0x1c8   : > { %v1042_v63 = vpop.permute.xlu2 %1041  ;;  %v958_v55 = vpop.permute.xlu1 %957  ;;  %v4476_v23 = vld [vmem:[#allocation81_spill] sm:$0xff]  ;;  %v1580_v43 = vsel %vm1548_vm1, %v1547_v61, %v3157_v7  ;;  %v4480_v61 = vld [vmem:[#allocation52_spill] sm:$0xff] }
 0x1c9   : > { %v3448_v15 = vsel %vm1647_vm4, %v1618_v57, %v1042_v63  ;;  %v3451_v24 = vsel %vm1614_vm3, %v1607_v17, %v958_v55  ;;  %v956_v62 = vpop.permute.xlu0 %955  ;;  %v2383_v57 = vld [vmem:[%s2542_s25 + $0x92] sm:$0xff]  ;;  %v2377_v63 = vld [vmem:[%s2542_s25 + $0x4a] sm:$0xff] }
 0x1ca   : > { %v3454_v26 = vsel %vm1614_vm3, %v1606_v2, %v956_v62  ;;  %v2351_v55 = vld [vmem:[%s2542_s25 + $0x91] sm:$0xff] }
 0x1cb   : > { %v4471_v2 = vld [vmem:[#allocation16_spill] sm:$0xff] }
 0x1cc   : > { %v4472_v62 = vld [vmem:[#allocation40_spill] sm:$0xff] }
 0x1ce   : > { %1295 = vrot.lane.b32.xlu2 %v2345_v46, %s2499_s8  ;;  %1179 = vrot.lane.b32.xlu1 %v4467_v13, %s2500_s9  ;;  %v1525_v46 = vsel %vm1515_vm0, %v4472_v62, %v4471_v2  ;;  %v4473_v13 = vld [vmem:[#allocation47_spill] sm:$0xff] }
 0x1cf   : > { %1167 = vrot.lane.b32.xlu0 %v4470_v30, %s2500_s9  ;;  %v1558_v50 = vsel %vm1548_vm1, %v1525_v46, %v4473_v13  ;;  %v1546_v30 = vsel %vm1515_vm0, %v4476_v23, %v4475_v40  ;;  %v4477_v46 = vld [vmem:[#allocation6_spill] sm:$0xff]  ;;  %v4478_v13 = vld [vmem:[#allocation31_spill] sm:$0xff] }
 0x1d0   : > { %v3467_v47 = vpop.permute.xlu2 %1047  ;;  %v3469_v16 = vpop.permute.xlu1 %963  ;;  %v1579_v56 = vsel %vm1548_vm1, %v1546_v30, %v3105_v31 }
 0x1d1   : > { %v962_v48 = vpop.permute.xlu0 %961  ;;  %v1612_v62 = vsel %vm1581_vm2, %v1579_v56, %v3275_v44  ;;  %v4479_v44 = vld [vmem:[#allocation54_spill] sm:$0xff] }
 0x1d2   : > { %v3474_v17 = vsel %vm1614_vm3, %v1609_v20, %v962_v48  ;;  %v1591_v20 = vsel %vm1581_vm2, %v1558_v50, %v3191_v21  ;;  %v1613_v48 = vsel %vm1581_vm2, %v1580_v43, %v3237_v32  ;;  %v2346_v32 = vld [vmem:[%s2542_s25 + $0x51] sm:$0xff]  ;;  %v1518_v50 = vsel %vm1515_vm0, %v4478_v13, %v4477_v46 }
 0x1d3   : > { %v1551_v19 = vsel %vm1548_vm1, %v1518_v50, %v4479_v44  ;;  %v4481_v46 = vld [vmem:[#allocation12_spill] sm:$0xff]  ;;  %v4482_v13 = vld [vmem:[#allocation41_spill] sm:$0xff]  ;;  %v4483_v44 = vld [vmem:[#allocation67_spill] sm:$0xff] }
 0x1d4   : > { %v1584_v40 = vsel %vm1581_vm2, %v1551_v19, %v3169_v10  ;;  %v1523_v50 = vsel %vm1515_vm0, %v4482_v13, %v4481_v46  ;;  %v4485_v46 = vld [vmem:[#allocation63_spill] sm:$0xff] }
 0x1d5   : > { %v1617_v23 = vsel %vm1614_vm3, %v1584_v40, %v3249_v35  ;;  %v4486_v13 = vld [vmem:[#allocation15_spill] sm:$0xff] }
 0x1d6   : > { %1435 = vrot.lane.b32.xlu2 %v2383_v57, %s2498_s7  ;;  %1423 = vrot.lane.b32.xlu1 %v2377_v63, %s2498_s7  ;;  %v1624_v57 = vsel %vm1614_vm3, %v1591_v20, %v3325_v58  ;;  %v2314_v58 = vld [vmem:[%s2542_s25 + $0x50] sm:$0xff] }
 0x1d7   : > { %1307 = vrot.lane.b32.xlu0 %v2351_v55, %s2499_s8 }
 0x1d8   : > { %v1054_v63 = vpop.permute.xlu2 %1053  ;;  %v970_v2 = vpop.permute.xlu1 %969 }
 0x1d9   : > { %v3506_v7 = vsel %vm1647_vm4, %v1624_v57, %v1054_v63  ;;  %v3509_v21 = vsel %vm1614_vm3, %v1613_v48, %v970_v2  ;;  %v968_v55 = vpop.permute.xlu0 %967  ;;  %v2378_v48 = vld [vmem:[%s2542_s25 + $0x52] sm:$0xff] }
 0x1da   : > { %v3512_v31 = vsel %vm1614_vm3, %v1612_v62, %v968_v55  ;;  %v2327_v57 = vld [vmem:[%s2542_s25 + $0xf0] sm:$0xff]  ;;  %v2352_v63 = vld [vmem:[%s2542_s25 + $0x99] sm:$0xff] }
 0x1db   : > { %v2391_v55 = vld [vmem:[%s2542_s25 + $0xf2] sm:$0xff] }
 0x1de   : > { %1297 = vrot.lane.b32.xlu2 %v2346_v32, %s2499_s8  ;;  %1181 = vrot.lane.b32.xlu1 %v4480_v61, %s2500_s9  ;;  %v2359_v32 = vld [vmem:[%s2542_s25 + $0xf1] sm:$0xff] }
 0x1df   : > { %1169 = vrot.lane.b32.xlu0 %v2314_v58, %s2500_s9  ;;  %v2384_v58 = vld [vmem:[%s2542_s25 + $0x9a] sm:$0xff] }
 0x1e0   : > { %v3529_v30 = vpop.permute.xlu2 %1059  ;;  %v1040_v43 = vpop.permute.xlu1 %1039 }
 0x1e1   : > { %v3532_v20 = vsel %vm1647_vm4, %v1617_v23, %v1040_v43  ;;  %v3534_v56 = vpop.permute.xlu0 %1037 }
 0x1e6   : > { %1425 = vrot.lane.b32.xlu2 %v2378_v48, %s2498_s7  ;;  %1195 = vrot.lane.b32.xlu1 %v2327_v57, %s2500_s9 }
 0x1e7   : > { %1309 = vrot.lane.b32.xlu0 %v2352_v63, %s2499_s8 }
 0x1e8   : > { %v1066_v10 = vpop.permute.xlu2 %1065  ;;  %v3542_v35 = vpop.permute.xlu1 %1045 }
 0x1e9   : > { %v3546_v2 = vsel %vm1647_vm4, %v3365_v39, %v1066_v10  ;;  %v3548_v62 = vpop.permute.xlu0 %1043  ;;  %v1556_v39 = vsel %vm1548_vm1, %v1523_v50, %v4483_v44  ;;  %v2347_v10 = vld [vmem:[%s2542_s25 + $0x61] sm:$0xff] }
 0x1ea   : > { %v1589_v19 = vsel %vm1581_vm2, %v1556_v39, %v3141_v8  ;;  %v4487_v50 = vld [vmem:[#allocation46_spill] sm:$0xff]  ;;  %v4488_v44 = vld [vmem:[#allocation71_spill] sm:$0xff]  ;;  %v4489_v39 = vld [vmem:[#allocation73_spill] sm:$0xff] }
 0x1eb   : > { %v1622_v43 = vsel %vm1614_vm3, %v1589_v19, %v3311_v60  ;;  %v1526_v60 = vsel %vm1515_vm0, %v4487_v50, %v4486_v13  ;;  %v2353_v50 = vld [vmem:[%s2542_s25 + $0xa9] sm:$0xff] }
 0x1ec   : > { %v1559_v19 = vsel %vm1548_vm1, %v1526_v60, %v4489_v39  ;;  %v4490_v60 = vld [vmem:[#allocation8_spill] sm:$0xff]  ;;  %v4493_v39 = vld [vmem:[#allocation78_spill] sm:$0xff] }
 0x1ee   : > { %1451 = vrot.lane.b32.xlu2 %v2391_v55, %s2498_s7  ;;  %1323 = vrot.lane.b32.xlu1 %v2359_v32, %s2499_s8  ;;  %v2321_v55 = vld [vmem:[%s2542_s25 + $0xa8] sm:$0xff]  ;;  %v2315_v32 = vld [vmem:[%s2542_s25 + $0x60] sm:$0xff] }
 0x1ef   : > { %1437 = vrot.lane.b32.xlu0 %v2384_v58, %s2498_s7  ;;  %v4484_v58 = vld [vmem:[#allocation35_spill] sm:$0xff] }
 0x1f0   : > { %v1072_v40 = vpop.permute.xlu2 %1071  ;;  %v3563_v23 = vpop.permute.xlu1 %1051  ;;  %v1537_v8 = vsel %vm1515_vm0, %v4485_v46, %v4484_v58 }
 0x1f1   : > { %v3569_v48 = vsel %vm1647_vm4, %v3396_v36, %v1072_v40  ;;  %v1050_v57 = vpop.permute.xlu0 %1049  ;;  %v1570_v36 = vsel %vm1548_vm1, %v1537_v8, %v4488_v44 }
 0x1f2   : > { %v3572_v63 = vsel %vm1647_vm4, %v1622_v43, %v1050_v57  ;;  %v1603_v40 = vsel %vm1581_vm2, %v1570_v36, %v3239_v33  ;;  %v1592_v43 = vsel %vm1581_vm2, %v1559_v19, %v3153_v11  ;;  %v4491_v11 = vld [vmem:[#allocation50_spill] sm:$0xff]  ;;  %v4494_v19 = vld [vmem:[#allocation79_spill] sm:$0xff] }
 0x1f3   : > { %v1636_v57 = vsel %vm1614_vm3, %v1603_v40, %v3416_v52  ;;  %v1530_v44 = vsel %vm1515_vm0, %v4491_v11, %v4490_v60  ;;  %v4492_v52 = vld [vmem:[#allocation18_spill] sm:$0xff]  ;;  %v2385_v11 = vld [vmem:[%s2542_s25 + $0xaa] sm:$0xff] }
 0x1f4   : > { %v1529_v36 = vsel %vm1515_vm0, %v4480_v61, %v4492_v52  ;;  %v2360_v60 = vld [vmem:[%s2542_s25 + $0xf9] sm:$0xff] }
 0x1f5   : > { %v1562_v40 = vsel %vm1548_vm1, %v1529_v36, %v4494_v19  ;;  %v4497_v36 = vld [vmem:[#allocation83_spill] sm:$0xff] }
 0x1f6   : > { %1299 = vrot.lane.b32.xlu2 %v2347_v10, %s2499_s8  ;;  %1183 = vrot.lane.b32.xlu1 %v2321_v55, %s2500_s9  ;;  %v1625_v10 = vsel %vm1614_vm3, %v1592_v43, %v3323_v6  ;;  %v1563_v6 = vsel %vm1548_vm1, %v1530_v44, %v4493_v39  ;;  %v1595_v61 = vsel %vm1581_vm2, %v1562_v40, %v3165_v14  ;;  %v2392_v14 = vld [vmem:[%s2542_s25 + $0xfa] sm:$0xff]  ;;  %v4496_v44 = vld [vmem:[#allocation56_spill] sm:$0xff] }
 0x1f7   : > { %1171 = vrot.lane.b32.xlu0 %v2315_v32, %s2500_s9  ;;  %v2379_v32 = vld [vmem:[%s2542_s25 + $0x62] sm:$0xff]  ;;  %v1596_v43 = vsel %vm1581_vm2, %v1563_v6, %v3217_v27 }
 0x1f8   : > { %v1078_v58 = vpop.permute.xlu2 %1077  ;;  %v3596_v8 = vpop.permute.xlu1 %1057 }
 0x1f9   : > { %v3601_v55 = vsel %vm1647_vm4, %v1636_v57, %v1078_v58  ;;  %v1056_v13 = vpop.permute.xlu0 %1055  ;;  %v1629_v57 = vsel %vm1614_vm3, %v1596_v43, %v3297_v53  ;;  %v4495_v53 = vld [vmem:[#allocation11_spill] sm:$0xff] }
 0x1fa   : > { %v3604_v33 = vsel %vm1647_vm4, %v1625_v10, %v1056_v13  ;;  %v1628_v13 = vsel %vm1614_vm3, %v1595_v61, %v3335_v37  ;;  %v1533_v52 = vsel %vm1515_vm0, %v4496_v44, %v4495_v53 }
 0x1fb   : > { %v1566_v37 = vsel %vm1548_vm1, %v1533_v52, %v4497_v36 }
 0x1fe   : > { %1427 = vrot.lane.b32.xlu2 %v2379_v32, %s2498_s7  ;;  %1197 = vrot.lane.b32.xlu1 %v4485_v46, %s2500_s9 }
 0x1ff   : > { %1311 = vrot.lane.b32.xlu0 %v2353_v50, %s2499_s8 }
 0x200   : > { %v1084_v58 = vpop.permute.xlu2 %1083  ;;  %v1064_v10 = vpop.permute.xlu1 %1063 }
 0x201   : > { %v3632_v46 = vsel %vm1647_vm4, %v3454_v26, %v1084_v58  ;;  %v3635_v32 = vsel %vm1647_vm4, %v1629_v57, %v1064_v10  ;;  %v1062_v27 = vpop.permute.xlu0 %1061  ;;  %v1599_v26 = vsel %vm1581_vm2, %v1566_v37, %v3229_v25  ;;  %v1783_v25 = vld [vmem:[%s4306_s1 + $0x20] sm:$0xf]  ;;  %v2348_v58 = vld [vmem:[%s2542_s25 + $0x69] sm:$0xff] }
 0x202   : > { %v3638_v50 = vsel %vm1647_vm4, %v1628_v13, %v1062_v27  ;;  %v1632_v39 = vsel %vm1614_vm3, %v1599_v26, %v3309_v59  ;;  %v1782_v59 = vld [vmem:[%s4306_s1 + $0x18] sm:$0xff]  ;;  %2407 = vmatpush.msk.msra.mxu0 %vm1885_vm5, %v1783_v25  ;;  %2443 = vmatpush.msk.msra.mxu1 %vm1885_vm5, %v1783_v25  ;;  %v2316_v10 = vld [vmem:[%s2542_s25 + $0x68] sm:$0xff]  ;;  %v4498_v13 = vld [vmem:[#allocation14_spill] sm:$0xff] }
 0x203   : > { %2444 = vmatpush.msk.msra.mxu2 %vm1885_vm5, %v1783_v25  ;;  %2445 = vmatpush.msk.msra.mxu3 %vm1885_vm5, %v1783_v25  ;;  %v4499_v27 = vld [vmem:[#allocation62_spill] sm:$0xff]  ;;  %v1780_v37 = vld [vmem:[%s4306_s1 + $0x8] sm:$0xff] }
 0x204   : > { %1901 = vmatpush.msra.mxu0 %v1782_v59  ;;  %2446 = vmatpush.msra.mxu1 %v1782_v59  ;;  %v2329_v26 = vld [vmem:[%s2542_s25 + $0x108] sm:$0xff]  ;;  %v4502_v25 = vld [vmem:[#allocation82_spill] sm:$0xff] }
 0x205   : > { %2447 = vmatpush.msra.mxu2 %v1782_v59  ;;  %2448 = vmatpush.msra.mxu3 %v1782_v59 }
 0x206   : > { %1453 = vrot.lane.b32.xlu2 %v2392_v14, %s2498_s7  ;;  %1325 = vrot.lane.b32.xlu1 %v2360_v60, %s2499_s8 }
 0x207   : > { %1439 = vrot.lane.b32.xlu0 %v2385_v11, %s2498_s7  ;;  %v1781_v11 = vld [vmem:[%s4306_s1 + $0x10] sm:$0xff] }
 0x208   : > { %v1090_v6 = vpop.permute.xlu2 %1089  ;;  %v1070_v19 = vpop.permute.xlu1 %1069  ;;  %1902 = vmatpush.msra.mxu0 %v1781_v11  ;;  %2449 = vmatpush.msra.mxu1 %v1781_v11 }
 0x209   : > { %v3657_v40 = vsel %vm1647_vm4, %v3474_v17, %v1090_v6  ;;  %v3660_v43 = vsel %vm1647_vm4, %v1632_v39, %v1070_v19  ;;  %v1068_v61 = vpop.permute.xlu0 %1067  ;;  %v2322_v17 = vld [vmem:[%s2542_s25 + $0xb0] sm:$0xff]  ;;  %2450 = vmatpush.msra.mxu2 %v1781_v11  ;;  %2451 = vmatpush.msra.mxu3 %v1781_v11  ;;  %v4500_v6 = vld [vmem:[#allocation17_spill] sm:$0xff]  ;;  %v4504_v11 = vld [vmem:[#allocation74_spill] sm:$0xff] }
 0x20a   : > { %v3664_v57 = vsel %vm1647_vm4, %v3362_v49, %v1068_v61  ;;  %v1536_v49 = vsel %vm1515_vm0, %v4499_v27, %v4498_v13  ;;  %1903 = vmatpush.msra.mxu0 %v1780_v37  ;;  %2452 = vmatpush.msra.mxu1 %v1780_v37  ;;  %v2354_v39 = vld [vmem:[%s2542_s25 + $0xb1] sm:$0xff] }
 0x20b   : > { %v1569_v14 = vsel %vm1548_vm1, %v1536_v49, %v3107_v45  ;;  %2453 = vmatpush.msra.mxu2 %v1780_v37  ;;  %v4501_v19 = vld [vmem:[#allocation68_spill] sm:$0xff]  ;;  %2454 = vmatpush.msra.mxu3 %v1780_v37 }
 0x20c   : > { %v1602_v60 = vsel %vm1581_vm2, %v1569_v14, %v3241_v28  ;;  %v1539_v61 = vsel %vm1515_vm0, %v4501_v19, %v4500_v6  ;;  %v2361_v49 = vld [vmem:[%s2542_s25 + $0x109] sm:$0xff]  ;;  %v2367_v6 = vld [vmem:[%s2542_s25 + $0x151] sm:$0xff] }
 0x20d   : > { %v1635_v53 = vsel %vm1614_vm3, %v1602_v60, %v3321_v3  ;;  %v2380_v14 = vld [vmem:[%s2542_s25 + $0x6a] sm:$0xff]  ;;  %v4503_v60 = vld [vmem:[#allocation21_spill] sm:$0xff] }
 0x20e   : > { %1301 = vrot.lane.b32.xlu2 %v2348_v58, %s2499_s8  ;;  %1185 = vrot.lane.b32.xlu1 %v2322_v17, %s2500_s9  ;;  %v4506_v19 = vld [vmem:[#allocation80_spill] sm:$0xff] }
 0x20f   : > { %1173 = vrot.lane.b32.xlu0 %v2316_v10, %s2500_s9 }
 0x210   : > { %v1096_v44 = vpop.permute.xlu2 %1095  ;;  %v1076_v45 = vpop.permute.xlu1 %1075 }
 0x211   : > { %v3692_v52 = vsel %vm1647_vm4, %v3512_v31, %v1096_v44  ;;  %v3695_v28 = vsel %vm1647_vm4, %v1635_v53, %v1076_v45  ;;  %v1074_v36 = vpop.permute.xlu0 %1073  ;;  %v1779_v31 = vld [vmem:[%s4306_s1] sm:$0xff] }
 0x212   : > { %v3702_v3 = vsel %vm1647_vm4, %v3393_v0, %v1074_v36  ;;  %1904 = vmatpush.msra.mxu0 %v1779_v31  ;;  %2455 = vmatpush.msra.mxu1 %v1779_v31  ;;  %v1572_v0 = vsel %vm1548_vm1, %v1539_v61, %v3119_v51 }
 0x213   : > { %2456 = vmatpush.msra.mxu2 %v1779_v31  ;;  %v1605_v59 = vsel %vm1581_vm2, %v1572_v0, %v3253_v18  ;;  %2457 = vmatpush.msra.mxu3 %v1779_v31  ;;  %v2386_v18 = vld [vmem:[%s2542_s25 + $0xb2] sm:$0xff] }
 0x214   : > { %v1638_v58 = vsel %vm1614_vm3, %v1605_v59, %v3333_v41  ;;  %v1542_v41 = vsel %vm1515_vm0, %v4504_v11, %v4503_v60  ;;  %v2349_v60 = vld [vmem:[%s2542_s25 + $0x79] sm:$0xff] }
 0x215   : > { %v1575_v53 = vsel %vm1548_vm1, %v1542_v41, %v3131_v5  ;;  %v2323_v11 = vld [vmem:[%s2542_s25 + $0xc0] sm:$0xff]  ;;  %v4508_v41 = vld [vmem:[#allocation7_spill] sm:$0xff] }
 0x216   : > { %1211 = vrot.lane.b32.xlu2 %v4502_v25, %s2500_s9  ;;  %1199 = vrot.lane.b32.xlu1 %v2329_v26, %s2500_s9  ;;  %v2399_v26 = vld [vmem:[%s2542_s25 + $0x152] sm:$0xff] }
 0x217   : > { %1313 = vrot.lane.b32.xlu0 %v2354_v39, %s2499_s8  ;;  %v2393_v39 = vld [vmem:[%s2542_s25 + $0x10a] sm:$0xff] }
 0x218   : > { %v3722_v17 = vpop.permute.xlu2 %1419  ;;  %v1082_v10 = vpop.permute.xlu1 %1081 }
 0x219   : > { %v3725_v13 = vsel %vm1647_vm4, %v1638_v58, %v1082_v10  ;;  %v1080_v51 = vpop.permute.xlu0 %1079 }
 0x21a   : > { %v3729_v27 = vsel %vm1647_vm4, %v3414_v22, %v1080_v51  ;;  %v1608_v22 = vsel %vm1581_vm2, %v1575_v53, %v3265_v34  ;;  %v4505_v34 = vld [vmem:[#allocation27_spill] sm:$0xff]  ;;  %v4509_v53 = vld [vmem:[#allocation33_spill] sm:$0xff] }
 0x21b   : > { %v1641_v44 = vsel %vm1614_vm3, %v1608_v22, %v3357_v1  ;;  %v1545_v61 = vsel %vm1515_vm0, %v4506_v19, %v4505_v34  ;;  %v4507_v1 = vld [vmem:[#allocation43_spill] sm:$0xff] }
 0x21c   : > { %v1544_v0 = vsel %vm1515_vm0, %v4502_v25, %v4507_v1  ;;  %v1578_v59 = vsel %vm1548_vm1, %v1545_v61, %v3143_v9  ;;  %v202_v34 = vld [vmem:[%s2542_s25 + $0x8] sm:$0xff]  ;;  %v2336_v61 = vld [vmem:[%s2542_s25 + $0x158] sm:$0xff]  ;;  %v2330_v1 = vld [vmem:[%s2542_s25 + $0x110] sm:$0xff] }
 0x21d   : > { %v1611_v58 = vsel %vm1581_vm2, %v1578_v59, %v3277_v38  ;;  %v4511_v59 = vld [vmem:[#allocation10_spill] sm:$0xff] }
 0x21e   : > { %1327 = vrot.lane.b32.xlu2 %v2361_v49, %s2499_s8  ;;  %1441 = vrot.lane.b32.xlu1 %v2386_v18, %s2498_s7  ;;  %v1644_v9 = vsel %vm1614_vm3, %v1611_v58, %v3388_v54  ;;  %v4512_v58 = vld [vmem:[#allocation55_spill] sm:$0xff] }
 0x21f   : > { %1429 = vrot.lane.b32.xlu0 %v2380_v14, %s2498_s7  ;;  %v201_v14 = vld [vmem:[%s2542_s25] sm:$0xff] }
 0x220   : > { %v3746_v45 = vpop.permute.xlu2 %1421  ;;  %v1088_v36 = vpop.permute.xlu1 %1087  ;;  %v1516_v54 = vsel %vm1515_vm0, %v201_v14, %v4508_v41 }
 0x221   : > { %v3749_v37 = vsel %vm1647_vm4, %v1641_v44, %v1088_v36  ;;  %v1086_v31 = vpop.permute.xlu0 %1085  ;;  %v1549_v22 = vsel %vm1548_vm1, %v1516_v54, %v4509_v53  ;;  %v2362_v54 = vld [vmem:[%s2542_s25 + $0x111] sm:$0xff]  ;;  %v2387_v53 = vld [vmem:[%s2542_s25 + $0xc2] sm:$0xff] }
 0x222   : > { %v3753_v5 = vsel %vm1647_vm4, %v3451_v24, %v1086_v31  ;;  %v1577_v24 = vsel %vm1548_vm1, %v1544_v0, %v3145_v4 }
 0x223   : > { %v1610_v25 = vsel %vm1581_vm2, %v1577_v24, %v3225_v29  ;;  %v2317_v29 = vld [vmem:[%s2542_s25 + $0x78] sm:$0xff]  ;;  %v1517_v24 = vsel %vm1515_vm0, %v202_v34, %v4511_v59  ;;  %v4515_v34 = vld [vmem:[#allocation4_spill] sm:$0xff] }
 0x224   : > { %v1643_v49 = vsel %vm1614_vm3, %v1610_v25, %v3469_v16  ;;  %v1582_v16 = vsel %vm1581_vm2, %v1549_v22, %v3155_v12  ;;  %v1550_v25 = vsel %vm1548_vm1, %v1517_v24, %v4512_v58  ;;  %v4518_v59 = vld [vmem:[#allocation92_spill] sm:$0xff] }
 0x225   : > { %v1615_v44 = vsel %vm1614_vm3, %v1582_v16, %v3289_v42  ;;  %v2355_v42 = vld [vmem:[%s2542_s25 + $0xc1] sm:$0xff] }
 0x226   : > { %1467 = vrot.lane.b32.xlu2 %v2399_v26, %s2498_s7  ;;  %1455 = vrot.lane.b32.xlu1 %v2393_v39, %s2498_s7  ;;  %v4510_v26 = vld [vmem:[#allocation58_spill] sm:$0xff] }
 0x227   : > { %1339 = vrot.lane.b32.xlu0 %v2367_v6, %s2499_s8  ;;  %v1648_v39 = vsel %vm1647_vm4, %v1615_v44, %v4510_v26  ;;  %v2381_v16 = vld [vmem:[%s2542_s25 + $0x7a] sm:$0xff] }
 0x228   : > { %v3777_v10 = vpop.permute.xlu2 %1295  ;;  %v1094_v51 = vpop.permute.xlu1 %1093  ;;  %v2400_v26 = vld [vmem:[%s2542_s25 + $0x15a] sm:$0xff] }
 0x229   : > { %v3782_v18 = vsel %vm1647_vm4, %v1644_v9, %v1094_v51  ;;  %v1092_v4 = vpop.permute.xlu0 %1091  ;;  %v4513_v9 = vld [vmem:[#allocation84_spill] sm:$0xff] }
 0x22a   : > { %v3786_v38 = vsel %vm1647_vm4, %v1643_v49, %v1092_v4  ;;  %v1583_v51 = vsel %vm1581_vm2, %v1550_v25, %v4513_v9 }
 0x22e   : > { %1303 = vrot.lane.b32.xlu2 %v2349_v60, %s2499_s8  ;;  %1187 = vrot.lane.b32.xlu1 %v2323_v11, %s2500_s9 }
 0x22f   : > { %1175 = vrot.lane.b32.xlu0 %v2317_v29, %s2500_s9 }
 0x230   : > { %v1436_v36 = vpop.permute.xlu2 %1435  ;;  %v1292_v31 = vpop.permute.xlu1 %1291 }
 0x231   : > { %v1164_v6 = vpop.permute.xlu0 %1163 }
 0x232   : > { %v1681_v19 = vsel %vm1680_vm6, %v1648_v39, %v1164_v6  ;;  %v2394_v39 = vld [vmem:[%s2542_s25 + $0x112] sm:$0xff]  ;;  %v2477_v6 = vld [vmem:[%s2542_s25 + $0x60] sm:$0xff] }
 0x233   : > { %v1714_v12 = vsel %vm1713_vm7, %v1681_v19, %v1292_v31  ;;  %v1524_v19 = vsel %vm1515_vm0, %v2477_v6, %v4515_v34  ;;  %v2363_v34 = vld [vmem:[%s2542_s25 + $0x121] sm:$0xff] }
 0x234   : > { %v1747_v0 = vsel %vm1746_vm8, %v1714_v12, %v3722_v17  ;;  %v4514_v17 = vld [vmem:[#allocation94_spill] sm:$0xff] }
 0x235   : > { %2408 = vmatmul.msk.f32.vlgmr.msra.gmra.mxu0 %vm1788_vm9, %v1747_v0  ;;  %v1616_v49 = vsel %vm1614_vm3, %v1583_v51, %v4514_v17  ;;  %v2368_v12 = vld [vmem:[%s2542_s25 + $0x159] sm:$0xff]  ;;  %v4517_v0 = vld [vmem:[#allocation88_spill] sm:$0xff] }
 0x236   : > { %1213 = vrot.lane.b32.xlu2 %v2336_v61, %s2500_s9  ;;  %1201 = vrot.lane.b32.xlu1 %v2330_v1, %s2500_s9  ;;  %v1649_v60 = vsel %vm1647_vm4, %v1616_v49, %v3534_v56 }
 0x237   : > { %1315 = vrot.lane.b32.xlu0 %v2355_v42, %s2499_s8 }
 0x238   : > { %v1298_v4 = vpop.permute.xlu2 %1297  ;;  %v1294_v14 = vpop.permute.xlu1 %1293 }
 0x239   : > { %v1166_v11 = vpop.permute.xlu0 %1165 }
 0x23a   : > { %v1682_v29 = vsel %vm1680_vm6, %v1649_v60, %v1166_v11  ;;  %v2324_v11 = vld [vmem:[%s2542_s25 + $0xc8] sm:$0xff] }
 0x23b   : > { %v1715_v41 = vsel %vm1713_vm7, %v1682_v29, %v1294_v14  ;;  %v2318_v29 = vld [vmem:[%s2542_s25 + $0x80] sm:$0xff] }
 0x23c   : > { %v1748_v22 = vsel %vm1746_vm8, %v1715_v41, %v3746_v45  ;;  %v4516_v45 = vld [vmem:[#allocation66_spill] sm:$0xff] }
 0x23d   : > { %2409 = vmatmul.msk.f32.gmra.mxu0 %vm1788_vm9, %v1748_v22  ;;  %v1557_v61 = vsel %vm1548_vm1, %v1524_v19, %v4516_v45  ;;  %v2337_v22 = vld [vmem:[%s2542_s25 + $0x168] sm:$0xff] }
 0x23e   : > { %1329 = vrot.lane.b32.xlu2 %v2362_v54, %s2499_s8  ;;  %1443 = vrot.lane.b32.xlu1 %v2387_v53, %s2498_s7  ;;  %v1590_v42 = vsel %vm1581_vm2, %v1557_v61, %v4517_v0 }
 0x23f   : > { %1431 = vrot.lane.b32.xlu0 %v2381_v16, %s2498_s7  ;;  %v1623_v24 = vsel %vm1614_vm3, %v1590_v42, %v4518_v59  ;;  %v2331_v16 = vld [vmem:[%s2542_s25 + $0x120] sm:$0xff] }
 0x240   : > { %v1426_v56 = vpop.permute.xlu2 %1425  ;;  %v1180_v44 = vpop.permute.xlu1 %1179  ;;  %v1656_v58 = vsel %vm1647_vm4, %v1623_v24, %v3563_v23  ;;  %v2350_v23 = vld [vmem:[%s2542_s25 + $0x81] sm:$0xff]  ;;  %v2401_v24 = vld [vmem:[%s2542_s25 + $0x16a] sm:$0xff] }
 0x241   : > { %v1168_v31 = vpop.permute.xlu0 %1167  ;;  %v1689_v51 = vsel %vm1680_vm6, %v1656_v58, %v1180_v44  ;;  %v2369_v58 = vld [vmem:[%s2542_s25 + $0x169] sm:$0xff] }
 0x242   : > { %v1683_v1 = vsel %vm1680_vm6, %v3532_v20, %v1168_v31  ;;  %v2356_v31 = vld [vmem:[%s2542_s25 + $0xc9] sm:$0xff] }
 0x243   : > { %v1716_v9 = vsel %vm1713_vm7, %v1683_v1, %v3777_v10 }
 0x246   : > { %1469 = vrot.lane.b32.xlu2 %v2400_v26, %s2498_s7  ;;  %1457 = vrot.lane.b32.xlu1 %v2394_v39, %s2498_s7 }
 0x247   : > { %1341 = vrot.lane.b32.xlu0 %v2368_v12, %s2499_s8 }
 0x248   : > { %v1452_v25 = vpop.permute.xlu2 %1451  ;;  %v1424_v20 = vpop.permute.xlu1 %1423 }
 0x249   : > { %v1308_v17 = vpop.permute.xlu0 %1307  ;;  %v1749_v49 = vsel %vm1746_vm8, %v1716_v9, %v1424_v20  ;;  %v4519_v20 = vld [vmem:[#allocation2_spill] sm:$0xff] }
 0x24a   : > { %v1722_v14 = vsel %vm1713_vm7, %v1689_v51, %v1308_v17  ;;  %2410 = vmatmul.msk.f32.gmra.mxu0 %vm1788_vm9, %v1749_v49  ;;  %v4520_v51 = vld [vmem:[#allocation61_spill] sm:$0xff] }
 0x24b   : > { %v1755_v60 = vsel %vm1746_vm8, %v1722_v14, %v1436_v36  ;;  %v4522_v14 = vld [vmem:[#allocation95_spill] sm:$0xff] }
 0x24c   : > { %2416 = vmatmul.msk.f32.vlgmr.msra.gmra.mxu1 %vm1788_vm9, %v1755_v60 }
 0x24e   : > { %1305 = vrot.lane.b32.xlu2 %v2350_v23, %s2499_s8  ;;  %1189 = vrot.lane.b32.xlu1 %v2324_v11, %s2500_s9 }
 0x24f   : > { %1177 = vrot.lane.b32.xlu0 %v2318_v29, %s2500_s9 }
 0x250   : > { %v1300_v10 = vpop.permute.xlu2 %1299  ;;  %v1182_v41 = vpop.permute.xlu1 %1181 }
 0x251   : > { %v1170_v54 = vpop.permute.xlu0 %1169 }
 0x252   : > { %v1684_v36 = vsel %vm1680_vm6, %v3448_v15, %v1170_v54  ;;  %v2388_v15 = vld [vmem:[%s2542_s25 + $0xca] sm:$0xff] }
 0x253   : > { %v1717_v53 = vsel %vm1713_vm7, %v1684_v36, %v1298_v4  ;;  %v2382_v4 = vld [vmem:[%s2542_s25 + $0x82] sm:$0xff] }
 0x254   : > { %v1750_v44 = vsel %vm1746_vm8, %v1717_v53, %v1426_v56  ;;  %v1690_v56 = vsel %vm1680_vm6, %v3506_v7, %v1182_v41  ;;  %v2395_v7 = vld [vmem:[%s2542_s25 + $0x122] sm:$0xff] }
 0x255   : > { %2411 = vmatmul.msk.f32.gmra.mxu0 %vm1788_vm9, %v1750_v44  ;;  %v2332_v53 = vld [vmem:[%s2542_s25 + $0x128] sm:$0xff]  ;;  %v2325_v44 = vld [vmem:[%s2542_s25 + $0xd8] sm:$0xff] }
 0x256   : > { %1215 = vrot.lane.b32.xlu2 %v2337_v22, %s2500_s9  ;;  %1203 = vrot.lane.b32.xlu1 %v2331_v16, %s2500_s9  ;;  %v2357_v22 = vld [vmem:[%s2542_s25 + $0xd9] sm:$0xff] }
 0x257   : > { %1317 = vrot.lane.b32.xlu0 %v2356_v31, %s2499_s8 }
 0x258   : > { %v1428_v26 = vpop.permute.xlu2 %1427  ;;  %v1196_v39 = vpop.permute.xlu1 %1195 }
 0x259   : > { %v1310_v6 = vpop.permute.xlu0 %1309  ;;  %v1697_v19 = vsel %vm1680_vm6, %v3664_v57, %v1196_v39  ;;  %v2478_v57 = vld [vmem:[%s2542_s25 + $0x30] sm:$0xff] }
 0x25a   : > { %v1723_v61 = vsel %vm1713_vm7, %v1690_v56, %v1310_v6  ;;  %v1520_v9 = vsel %vm1515_vm0, %v2478_v57, %v4519_v20  ;;  %v2364_v6 = vld [vmem:[%s2542_s25 + $0x129] sm:$0xff]  ;;  %v2326_v57 = vld [vmem:[%s2542_s25 + $0xe0] sm:$0xff] }
 0x25b   : > { %v1553_v17 = vsel %vm1548_vm1, %v1520_v9, %v4520_v51  ;;  %v2479_v51 = vld [vmem:[%s2542_s25 + $0x38] sm:$0xff] }
 0x25e   : > { %1331 = vrot.lane.b32.xlu2 %v2363_v34, %s2499_s8  ;;  %1445 = vrot.lane.b32.xlu1 %v2388_v15, %s2498_s7  ;;  %v2389_v34 = vld [vmem:[%s2542_s25 + $0xda] sm:$0xff] }
 0x25f   : > { %1433 = vrot.lane.b32.xlu0 %v2382_v4, %s2498_s7 }
 0x260   : > { %v1454_v12 = vpop.permute.xlu2 %1453  ;;  %v1324_v45 = vpop.permute.xlu1 %1323 }
 0x261   : > { %v1730_v1 = vsel %vm1713_vm7, %v1697_v19, %v1324_v45  ;;  %v1438_v0 = vpop.permute.xlu0 %1437 }
 0x262   : > { %v1756_v42 = vsel %vm1746_vm8, %v1723_v61, %v1438_v0  ;;  %v1763_v59 = vsel %vm1746_vm8, %v1730_v1, %v1452_v25  ;;  %v4521_v25 = vld [vmem:[#allocation85_spill] sm:$0xff] }
 0x263   : > { %2417 = vmatmul.msk.f32.gmra.mxu1 %vm1788_vm9, %v1756_v42  ;;  %2424 = vmatmul.msk.f32.vlgmr.msra.gmra.mxu2 %vm1788_vm9, %v1763_v59  ;;  %v1586_v49 = vsel %vm1581_vm2, %v1553_v17, %v4521_v25  ;;  %v2370_v42 = vld [vmem:[%s2542_s25 + $0x171] sm:$0xff]  ;;  %v4523_v17 = vld [vmem:[#allocation3_spill] sm:$0xff] }
 0x264   : > { %v1619_v60 = vsel %vm1614_vm3, %v1586_v49, %v4522_v14  ;;  %v1521_v25 = vsel %vm1515_vm0, %v2479_v51, %v4523_v17  ;;  %v2480_v14 = vld [vmem:[%s2542_s25 + $0x80] sm:$0xff] }
 0x265   : > { %v1652_v29 = vsel %vm1647_vm4, %v1619_v60, %v3548_v62  ;;  %v4524_v60 = vld [vmem:[#allocation5_spill] sm:$0xff] }
 0x266   : > { %1471 = vrot.lane.b32.xlu2 %v2401_v24, %s2498_s7  ;;  %1459 = vrot.lane.b32.xlu1 %v2395_v7, %s2498_s7 }
 0x267   : > { %1343 = vrot.lane.b32.xlu0 %v2369_v58, %s2499_s8  ;;  %v2333_v58 = vld [vmem:[%s2542_s25 + $0x138] sm:$0xff] }
 0x268   : > { %v3912_v23 = vpop.permute.xlu2 %1301  ;;  %v1184_v11 = vpop.permute.xlu1 %1183 }
 0x269   : > { %v1172_v41 = vpop.permute.xlu0 %1171 }
 0x26a   : > { %v1685_v54 = vsel %vm1680_vm6, %v1652_v29, %v1172_v41  ;;  %v4525_v29 = vld [vmem:[#allocation60_spill] sm:$0xff] }
 0x26b   : > { %v1718_v36 = vsel %vm1713_vm7, %v1685_v54, %v1300_v10  ;;  %v2338_v10 = vld [vmem:[%s2542_s25 + $0x170] sm:$0xff]  ;;  %v1554_v41 = vsel %vm1548_vm1, %v1521_v25, %v4525_v29  ;;  %v2398_v29 = vld [vmem:[%s2542_s25 + $0x142] sm:$0xff] }
 0x26c   : > { %v1751_v16 = vsel %vm1746_vm8, %v1718_v36, %v1428_v26  ;;  %v1691_v26 = vsel %vm1680_vm6, %v3604_v33, %v1184_v11  ;;  %v2402_v33 = vld [vmem:[%s2542_s25 + $0x172] sm:$0xff]  ;;  %v1527_v11 = vsel %vm1515_vm0, %v2480_v14, %v4524_v60  ;;  %v2340_v14 = vld [vmem:[%s2542_s25 + $0x188] sm:$0xff] }
 0x26d   : > { %2412 = vmatmul.msk.f32.gmra.mxu0 %vm1788_vm9, %v1751_v16  ;;  %v4526_v54 = vld [vmem:[#allocation72_spill] sm:$0xff]  ;;  %v2365_v16 = vld [vmem:[%s2542_s25 + $0x139] sm:$0xff]  ;;  %v2366_v60 = vld [vmem:[%s2542_s25 + $0x141] sm:$0xff] }
 0x26e   : > { %1205 = vrot.lane.b32.xlu2 %v2332_v53, %s2500_s9  ;;  %1319 = vrot.lane.b32.xlu1 %v2357_v22, %s2499_s8  ;;  %v1560_v36 = vsel %vm1548_vm1, %v1527_v11, %v4526_v54  ;;  %v4527_v53 = vld [vmem:[#allocation87_spill] sm:$0xff] }
 0x26f   : > { %1191 = vrot.lane.b32.xlu0 %v2325_v44, %s2500_s9  ;;  %v1587_v22 = vsel %vm1581_vm2, %v1554_v41, %v4527_v53  ;;  %v2390_v44 = vld [vmem:[%s2542_s25 + $0xe2] sm:$0xff]  ;;  %v4532_v53 = vld [vmem:[#allocation13_spill] sm:$0xff] }
 0x270   : > { %v3926_v62 = vpop.permute.xlu2 %1211  ;;  %v1198_v31 = vpop.permute.xlu1 %1197  ;;  %v2372_v41 = vld [vmem:[%s2542_s25 + $0x189] sm:$0xff] }
 0x271   : > { %v1312_v39 = vpop.permute.xlu0 %1311  ;;  %v1698_v15 = vsel %vm1680_vm6, %v3660_v43, %v1198_v31  ;;  %v2396_v43 = vld [vmem:[%s2542_s25 + $0x12a] sm:$0xff]  ;;  %v4528_v31 = vld [vmem:[#allocation90_spill] sm:$0xff]  ;;  %v1705_v17 = vsel %vm1680_vm6, %v3632_v46, %v3926_v62 }
 0x272   : > { %v1724_v19 = vsel %vm1713_vm7, %v1691_v26, %v1312_v39  ;;  %v1593_v39 = vsel %vm1581_vm2, %v1560_v36, %v4528_v31  ;;  %v4530_v26 = vld [vmem:[#allocation93_spill] sm:$0xff]  ;;  %v2482_v36 = vld [vmem:[%s2542_s25 + $0x48] sm:$0xff] }
 0x273   : > { %v4533_v31 = vld [vmem:[#allocation19_spill] sm:$0xff] }
 0x276   : > { %1333 = vrot.lane.b32.xlu2 %v2364_v6, %s2499_s8  ;;  %1447 = vrot.lane.b32.xlu1 %v2389_v34, %s2498_s7  ;;  %v4529_v6 = vld [vmem:[#allocation91_spill] sm:$0xff] }
 0x277   : > { %1217 = vrot.lane.b32.xlu0 %v2338_v10, %s2500_s9  ;;  %v1620_v34 = vsel %vm1614_vm3, %v1587_v22, %v4529_v6  ;;  %v2339_v10 = vld [vmem:[%s2542_s25 + $0x180] sm:$0xff]  ;;  %v1522_v22 = vsel %vm1515_vm0, %v2482_v36, %v4532_v53 }
 0x278   : > { %v3938_v4 = vpop.permute.xlu2 %1327  ;;  %v1326_v56 = vpop.permute.xlu1 %1325  ;;  %v4534_v6 = vld [vmem:[#allocation42_spill] sm:$0xff] }
 0x279   : > { %v1731_v45 = vsel %vm1713_vm7, %v1698_v15, %v1326_v56  ;;  %v1440_v61 = vpop.permute.xlu0 %1439  ;;  %v1626_v15 = vsel %vm1614_vm3, %v1593_v39, %v4530_v26  ;;  %v1653_v56 = vsel %vm1647_vm4, %v1620_v34, %v3542_v35  ;;  %v1555_v34 = vsel %vm1548_vm1, %v1522_v22, %v4534_v6  ;;  %v4535_v26 = vld [vmem:[#allocation53_spill] sm:$0xff] }
 0x27a   : > { %v1757_v1 = vsel %vm1746_vm8, %v1724_v19, %v1440_v61  ;;  %v1764_v0 = vsel %vm1746_vm8, %v1731_v45, %v1454_v12  ;;  %v2358_v12 = vld [vmem:[%s2542_s25 + $0xe1] sm:$0xff]  ;;  %v1659_v19 = vsel %vm1647_vm4, %v1626_v15, %v3596_v8 }
 0x27b   : > { %2418 = vmatmul.msk.f32.gmra.mxu1 %vm1788_vm9, %v1757_v1  ;;  %2425 = vmatmul.msk.f32.gmra.mxu2 %vm1788_vm9, %v1764_v0 }
 0x27e   : > { %1473 = vrot.lane.b32.xlu2 %v2402_v33, %s2498_s7  ;;  %1461 = vrot.lane.b32.xlu1 %v2396_v43, %s2498_s7 }
 0x27f   : > { %1345 = vrot.lane.b32.xlu0 %v2370_v42, %s2499_s8 }
 0x280   : > { %v1468_v59 = vpop.permute.xlu2 %1467  ;;  %v1186_v24 = vpop.permute.xlu1 %1185 }
 0x281   : > { %v1174_v7 = vpop.permute.xlu0 %1173  ;;  %v1692_v61 = vsel %vm1680_vm6, %v1659_v19, %v1186_v24  ;;  %v2397_v24 = vld [vmem:[%s2542_s25 + $0x13a] sm:$0xff] }
 0x282   : > { %v1686_v45 = vsel %vm1680_vm6, %v1653_v56, %v1174_v7  ;;  %v4536_v56 = vld [vmem:[#allocation86_spill] sm:$0xff] }
 0x283   : > { %v1719_v8 = vsel %vm1713_vm7, %v1686_v45, %v3912_v23  ;;  %v2481_v23 = vld [vmem:[%s2542_s25 + $0x181] sm:$0xff]  ;;  %v1588_v19 = vsel %vm1581_vm2, %v1555_v34, %v4536_v56  ;;  %v2373_v45 = vld [vmem:[%s2542_s25 + $0x199] sm:$0xff] }
 0x286   : > { %1207 = vrot.lane.b32.xlu2 %v2333_v58, %s2500_s9  ;;  %1321 = vrot.lane.b32.xlu1 %v2358_v12, %s2499_s8  ;;  %v4531_v58 = vld [vmem:[#allocation22_spill] sm:$0xff] }
 0x287   : > { %1193 = vrot.lane.b32.xlu0 %v2326_v57, %s2500_s9 }
 0x288   : > { %v3958_v20 = vpop.permute.xlu2 %1303  ;;  %v1200_v9 = vpop.permute.xlu1 %1199 }
 0x289   : > { %v1314_v49 = vpop.permute.xlu0 %1313  ;;  %v1699_v7 = vsel %vm1680_vm6, %v3569_v48, %v1200_v9 }
 0x28a   : > { %v1725_v1 = vsel %vm1713_vm7, %v1692_v61, %v1314_v49  ;;  %v1732_v51 = vsel %vm1713_vm7, %v1699_v7, %v3938_v4  ;;  %v2334_v4 = vld [vmem:[%s2542_s25 + $0x140] sm:$0xff] }
 0x28b   : > { %v2405_v61 = vld [vmem:[%s2542_s25 + $0x19a] sm:$0xff] }
 0x28e   : > { %1335 = vrot.lane.b32.xlu2 %v2365_v16, %s2499_s8  ;;  %1449 = vrot.lane.b32.xlu1 %v2390_v44, %s2498_s7  ;;  %v2483_v44 = vld [vmem:[%s2542_s25 + $0x90] sm:$0xff] }
 0x28f   : > { %1219 = vrot.lane.b32.xlu0 %v2339_v10, %s2500_s9  ;;  %v1528_v39 = vsel %vm1515_vm0, %v2483_v44, %v4533_v31 }
 0x290   : > { %v3991_v0 = vpop.permute.xlu2 %1213  ;;  %v1442_v35 = vpop.permute.xlu1 %1441  ;;  %v1561_v15 = vsel %vm1548_vm1, %v1528_v39, %v4535_v26 }
 0x291   : > { %v1430_v33 = vpop.permute.xlu0 %1429  ;;  %v1758_v43 = vsel %vm1746_vm8, %v1725_v1, %v1442_v35  ;;  %v4537_v1 = vld [vmem:[#allocation89_spill] sm:$0xff] }
 0x292   : > { %v1752_v42 = vsel %vm1746_vm8, %v1719_v8, %v1430_v33  ;;  %2419 = vmatmul.msk.f32.gmra.mxu1 %vm1788_vm9, %v1758_v43  ;;  %v1594_v35 = vsel %vm1581_vm2, %v1561_v15, %v4537_v1  ;;  %v4538_v33 = vld [vmem:[#allocation96_spill] sm:$0xff]  ;;  %v2341_v43 = vld [vmem:[%s2542_s25 + $0x198] sm:$0xff] }
 0x293   : > { %2413 = vmatmul.msk.f32.gmra.mxu0 %vm1788_vm9, %v1752_v42  ;;  %v1621_v8 = vsel %vm1614_vm3, %v1588_v19, %v4538_v33  ;;  %v4539_v42 = vld [vmem:[#allocation97_spill] sm:$0xff] }
 0x294   : > { %v1654_v7 = vsel %vm1647_vm4, %v1621_v8, %v3467_v47  ;;  %v4066_v47 = vld [vmem:[%s4307_s2] ss:$0 sm:$0xff] }
 0x296   : > { %1463 = vrot.lane.b32.xlu1 %v2397_v24, %s2498_s7  ;;  %1475 = vrot.lane.b32.xlu2 %v4531_v58, %s2498_s7  ;;  %v1627_v24 = vsel %vm1614_vm3, %v1594_v35, %v4539_v42 }
 0x297   : > { %1347 = vrot.lane.b32.xlu0 %v2481_v23, %s2499_s8  ;;  %v1660_v58 = vsel %vm1647_vm4, %v1627_v24, %v3529_v30 }
 0x298   : > { %v4007_v12 = vpop.permute.xlu2 %1329  ;;  %v1456_v57 = vpop.permute.xlu1 %1455 }
 0x299   : > { %v1340_v48 = vpop.permute.xlu0 %1339  ;;  %v1765_v9 = vsel %vm1746_vm8, %v1732_v51, %v1456_v57 }
 0x29a   : > { %v1738_v25 = vsel %vm1713_vm7, %v1705_v17, %v1340_v48  ;;  %2426 = vmatmul.msk.f32.gmra.mxu2 %vm1788_vm9, %v1765_v9 }
 0x29b   : > { %v1771_v49 = vsel %vm1746_vm8, %v1738_v25, %v1468_v59  ;;  %v2310_v59 = vld [vmem:[%s2542_s25 + $0x18a] sm:$0xff] }
 0x29c   : > { %2432 = vmatmul.msk.f32.vlgmr.msra.gmra.mxu3 %vm1788_vm9, %v1771_v49 }
 0x29e   : > { %1221 = vrot.lane.b32.xlu1 %v2340_v14, %s2500_s9  ;;  %1337 = vrot.lane.b32.xlu2 %v2366_v60, %s2499_s8  ;;  %v2342_v60 = vld [vmem:[%s2542_s25 + $0x1a0] sm:$0xff] }
 0x29f   : > { %1209 = vrot.lane.b32.xlu0 %v2334_v4, %s2500_s9  ;;  %v2374_v4 = vld [vmem:[%s2542_s25 + $0x1a1] sm:$0xff] }
 0x2a0   : > { %v1470_v46 = vpop.permute.xlu2 %1469  ;;  %v1188_v62 = vpop.permute.xlu1 %1187 }
 0x2a1   : > { %v1176_v11 = vpop.permute.xlu0 %1175  ;;  %v1693_v57 = vsel %vm1680_vm6, %v1660_v58, %v1188_v62 }
 0x2a2   : > { %v1687_v23 = vsel %vm1680_vm6, %v1654_v7, %v1176_v11 }
 0x2a3   : > { %v1720_v48 = vsel %vm1713_vm7, %v1687_v23, %v3958_v20 }
 0x2a6   : > { %1465 = vrot.lane.b32.xlu1 %v2398_v29, %s2498_s7  ;;  %1477 = vrot.lane.b32.xlu2 %v2310_v59, %s2498_s7 }
 0x2a7   : > { %1349 = vrot.lane.b32.xlu0 %v2372_v41, %s2499_s8  ;;  %v1706_v41 = vsel %vm1680_vm6, %v3753_v5, %v3991_v0 }
 0x2a8   : > { %v1202_v54 = vpop.permute.xlu1 %1201  ;;  %v4039_v10 = vpop.permute.xlu2 %1305 }
 0x2a9   : > { %v1316_v16 = vpop.permute.xlu0 %1315  ;;  %v1700_v11 = vsel %vm1680_vm6, %v3702_v3, %v1202_v54 }
 0x2aa   : > { %v1726_v30 = vsel %vm1713_vm7, %v1693_v57, %v1316_v16  ;;  %v1733_v29 = vsel %vm1713_vm7, %v1700_v11, %v4007_v12  ;;  %v2406_v16 = vld [vmem:[%s2542_s25 + $0x1a2] sm:$0xff] }
 0x2ae   : > { %1351 = vrot.lane.b32.xlu1 %v2373_v45, %s2499_s8  ;;  %1479 = vrot.lane.b32.xlu2 %v2405_v61, %s2498_s7 }
 0x2af   : > { %1223 = vrot.lane.b32.xlu0 %v2341_v43, %s2500_s9 }
 0x2b0   : > { %v1444_v51 = vpop.permute.xlu1 %1443  ;;  %v1216_v62 = vpop.permute.xlu2 %1215 }
 0x2b1   : > { %v1432_v17 = vpop.permute.xlu0 %1431  ;;  %v1759_v9 = vsel %vm1746_vm8, %v1726_v30, %v1444_v51 }
 0x2b2   : > { %v1906_v25 = vpop.f32.mrf.mxu0  ;;  %v1753_v49 = vsel %vm1746_vm8, %v1720_v48, %v1432_v17  ;;  %2420 = vmatmul.msk.f32.gmra.mxu1 %vm1788_vm9, %v1759_v9 }
 0x2b3   : > { %v1907_v14 = vadd.f32 %v4066_v47, %v1906_v25  ;;  %2414 = vmatmul.msk.f32.gmra.mxu0 %vm1788_vm9, %v1753_v49  ;;  %v1707_v25 = vsel %vm1680_vm6, %v3749_v37, %v1216_v62 }
 0x2b5   : > { %2002 = vst [vmem:[%s2537_s22] sm:$0xff] %v1907_v14  ;;  %v2071_v12 = vmul.f32 %v1907_v14, %v1907_v14 }
 0x2b6   : > { %1225 = vrot.lane.b32.xlu1 %v2342_v60, %s2500_s9  ;;  %1353 = vrot.lane.b32.xlu2 %v2374_v4, %s2499_s8 }
 0x2b7   : > { %1097 = vrot.lane.b32.xlu0 %v2310_v59, %s2497_s6 }
 0x2b8   : > { %v1458_v20 = vpop.permute.xlu1 %1457  ;;  %v1332_v0 = vpop.permute.xlu2 %1331 }
 0x2b9   : > { %v1342_v36 = vpop.permute.xlu0 %1341  ;;  %v1766_v3 = vsel %vm1746_vm8, %v1733_v29, %v1458_v20 }
 0x2ba   : > { %v1739_v54 = vsel %vm1713_vm7, %v1706_v41, %v1342_v36  ;;  %v1909_v53 = vpop.f32.mrf.mxu0  ;;  %2427 = vmatmul.msk.f32.gmra.mxu2 %vm1788_vm9, %v1766_v3 }
 0x2bb   : > { %v1910_v22 = vadd.f32 %v4066_v47, %v1909_v53  ;;  %v1772_v59 = vsel %vm1746_vm8, %v1739_v54, %v1470_v46 }
 0x2bc   : > { %2433 = vmatmul.msk.f32.gmra.mxu3 %vm1788_vm9, %v1772_v59 }
 0x2bd   : > { %2003 = vst [vmem:[%s2537_s22 + $0x8] sm:$0xff] %v1910_v22  ;;  %v2034_v44 = vadd.f32 %v1910_v22, %v1907_v14  ;;  %v2072_v5 = vmul.f32 %v1910_v22, %v1910_v22 }
 0x2bf   : > { %v2103_v31 = vadd.f32 %v2072_v5, %v2071_v12  ;;  %1481 = vrot.lane.b32.xlu0 %v2406_v16, %s2498_s7 }
 0x2c0   : > { %v1190_v39 = vpop.permute.xlu1 %1189  ;;  %v1472_v26 = vpop.permute.xlu2 %1471 }
 0x2c1   : > { %v1178_v6 = vpop.permute.xlu0 %1177  ;;  %v1694_v8 = vsel %vm1680_vm6, %v3638_v50, %v1190_v39 }
 0x2c2   : > { %v1688_v33 = vsel %vm1680_vm6, %v3572_v63, %v1178_v6 }
 0x2c3   : > { %v1721_v7 = vsel %vm1713_vm7, %v1688_v33, %v4039_v10 }
 0x2c7   : > { %v1912_v34 = vpop.f32.mrf.mxu0 }
 0x2c8   : > { %v1913_v15 = vadd.f32 %v4066_v47, %v1912_v34  ;;  %v1204_v46 = vpop.permute.xlu1 %1203  ;;  %v1206_v23 = vpop.permute.xlu2 %1205 }
 0x2c9   : > { %v1318_v56 = vpop.permute.xlu0 %1317  ;;  %v1930_v19 = vpop.f32.mrf.mxu1  ;;  %v1701_v50 = vsel %vm1680_vm6, %v3695_v28, %v1204_v46 }
 0x2ca   : > { %2004 = vst [vmem:[%s2537_s22 + $0x10] sm:$0xff] %v1913_v15  ;;  %v2035_v45 = vadd.f32 %v2034_v44, %v1913_v15  ;;  %v2073_v61 = vmul.f32 %v1913_v15, %v1913_v15  ;;  %v4101_v1 = vadd.f32 %v4066_v47, %v1930_v19  ;;  %v1727_v43 = vsel %vm1713_vm7, %v1694_v8, %v1318_v56 }
 0x2cb   : > { %v1734_v9 = vsel %vm1713_vm7, %v1701_v50, %v1332_v0  ;;  %v1702_v0 = vsel %vm1680_vm6, %v3601_v55, %v1206_v23 }
 0x2cc   : > { %v2104_v35 = vadd.f32 %v2103_v31, %v2073_v61  ;;  %2010 = vst [vmem:[%s2537_s22 + $0x40] sm:$0xff] %v4101_v1 }
 0x2d0   : > { %v1446_v42 = vpop.permute.xlu1 %1445  ;;  %v1334_v4 = vpop.permute.xlu2 %1333 }
 0x2d1   : > { %v1434_v24 = vpop.permute.xlu0 %1433  ;;  %v1760_v58 = vsel %vm1746_vm8, %v1727_v43, %v1446_v42  ;;  %v1735_v39 = vsel %vm1713_vm7, %v1702_v0, %v1334_v4 }
 0x2d2   : > { %v1915_v57 = vpop.f32.mrf.mxu0  ;;  %v1754_v30 = vsel %vm1746_vm8, %v1721_v7, %v1434_v24  ;;  %2421 = vmatmul.msk.f32.gmra.mxu1 %vm1788_vm9, %v1760_v58 }
 0x2d3   : > { %v1916_v63 = vadd.f32 %v4066_v47, %v1915_v57  ;;  %2415 = vmatmul.msk.f32.gmra.mxu0 %vm1788_vm9, %v1754_v30 }
 0x2d5   : > { %2005 = vst [vmem:[%s2537_s22 + $0x18] sm:$0xff] %v1916_v63  ;;  %v2036_v51 = vadd.f32 %v2035_v45, %v1916_v63  ;;  %v2074_v17 = vmul.f32 %v1916_v63, %v1916_v63 }
 0x2d7   : > { %v2105_v10 = vadd.f32 %v2104_v35, %v2074_v17 }
 0x2d8   : > { %v1460_v48 = vpop.permute.xlu1 %1459  ;;  %v1474_v62 = vpop.permute.xlu2 %1473 }
 0x2d9   : > { %v1344_v49 = vpop.permute.xlu0 %1343  ;;  %v1767_v14 = vsel %vm1746_vm8, %v1734_v9, %v1460_v48 }
 0x2da   : > { %v1740_v60 = vsel %vm1713_vm7, %v1707_v25, %v1344_v49  ;;  %2428 = vmatmul.msk.f32.gmra.mxu2 %vm1788_vm9, %v1767_v14 }
 0x2db   : > { %v1773_v28 = vsel %vm1746_vm8, %v1740_v60, %v1472_v26 }
 0x2dc   : > { %2434 = vmatmul.msk.f32.gmra.mxu3 %vm1788_vm9, %v1773_v28 }
 0x2e0   : > { %v1933_v11 = vpop.f32.mrf.mxu1  ;;  %v1320_v29 = vpop.permute.xlu1 %1319 }
 0x2e1   : > { %v4129_v20 = vadd.f32 %v4066_v47, %v1933_v11  ;;  %v1192_v37 = vpop.permute.xlu0 %1191  ;;  %v1208_v31 = vpop.permute.xlu2 %1207 }
 0x2e2   : > { %v1695_v41 = vsel %vm1680_vm6, %v3635_v32, %v1192_v37  ;;  %v1703_v23 = vsel %vm1680_vm6, %v3729_v27, %v1208_v31 }
 0x2e3   : > { %2011 = vst [vmem:[%s2537_s22 + $0x48] sm:$0xff] %v4129_v20  ;;  %v1728_v22 = vsel %vm1713_vm7, %v1695_v41, %v1320_v29 }
 0x2e6   : > { %v1954_v36 = vpop.f32.mrf.mxu2 }
 0x2e7   : > { %v4136_v3 = vadd.f32 %v4066_v47, %v1954_v36 }
 0x2e8   : > { %v1448_v54 = vpop.permute.xlu1 %1447 }
 0x2e9   : > { %2018 = vst [vmem:[%s2537_s22 + $0x80] sm:$0xff] %v4136_v3  ;;  %v1218_v53 = vpop.permute.xlu0 %1217  ;;  %v1761_v16 = vsel %vm1746_vm8, %v1728_v22, %v1448_v54 }
 0x2ea   : > { %v1918_v59 = vpop.f32.mrf.mxu0  ;;  %2422 = vmatmul.msk.f32.gmra.mxu1 %vm1788_vm9, %v1761_v16  ;;  %v1708_v6 = vsel %vm1680_vm6, %v3657_v40, %v1218_v53  ;;  %v1336_v40 = vpop.permute.xlu2 %1335 }
 0x2eb   : > { %v1919_v12 = vadd.f32 %v4066_v47, %v1918_v59 }
 0x2ed   : > { %2006 = vst [vmem:[%s2537_s22 + $0x20] sm:$0xff] %v1919_v12  ;;  %v2037_v44 = vadd.f32 %v2036_v51, %v1919_v12  ;;  %v2075_v32 = vmul.f32 %v1919_v12, %v1919_v12 }
 0x2ef   : > { %v2106_v5 = vadd.f32 %v2105_v10, %v2075_v32 }
 0x2f0   : > { %v1462_v34 = vpop.permute.xlu1 %1461 }
 0x2f1   : > { %v1346_v26 = vpop.permute.xlu0 %1345  ;;  %v1768_v46 = vsel %vm1746_vm8, %v1735_v39, %v1462_v34 }
 0x2f2   : > { %v1741_v15 = vsel %vm1713_vm7, %v1708_v6, %v1346_v26  ;;  %2429 = vmatmul.msk.f32.gmra.mxu2 %vm1788_vm9, %v1768_v46  ;;  %v1476_v58 = vpop.permute.xlu2 %1475 }
 0x2f3   : > { %v1774_v56 = vsel %vm1746_vm8, %v1741_v15, %v1474_v62 }
 0x2f4   : > { %2435 = vmatmul.msk.f32.gmra.mxu3 %vm1788_vm9, %v1774_v56 }
 0x2f8   : > { %v1936_v55 = vpop.f32.mrf.mxu1  ;;  %v1322_v45 = vpop.permute.xlu1 %1321 }
 0x2f9   : > { %v4156_v19 = vadd.f32 %v4066_v47, %v1936_v55  ;;  %v1194_v61 = vpop.permute.xlu0 %1193 }
 0x2fa   : > { %v1696_v35 = vsel %vm1680_vm6, %v3546_v2, %v1194_v61  ;;  %v1736_v2 = vsel %vm1713_vm7, %v1703_v23, %v1336_v40  ;;  %v1338_v27 = vpop.permute.xlu2 %1337 }
 0x2fb   : > { %2012 = vst [vmem:[%s2537_s22 + $0x50] sm:$0xff] %v4156_v19  ;;  %v1729_v24 = vsel %vm1713_vm7, %v1696_v35, %v1322_v45 }
 0x2fe   : > { %v1957_v33 = vpop.f32.mrf.mxu2 }
 0x2ff   : > { %v4163_v8 = vadd.f32 %v4066_v47, %v1957_v33 }
 0x300   : > { %v1450_v43 = vpop.permute.xlu1 %1449 }
 0x301   : > { %2019 = vst [vmem:[%s2537_s22 + $0x88] sm:$0xff] %v4163_v8  ;;  %v1220_v42 = vpop.permute.xlu0 %1219  ;;  %v1762_v7 = vsel %vm1746_vm8, %v1729_v24, %v1450_v43 }
 0x302   : > { %2423 = vmatmul.msk.f32.gmra.mxu1 %vm1788_vm9, %v1762_v7  ;;  %v1709_v57 = vsel %vm1680_vm6, %v3786_v38, %v1220_v42  ;;  %v1478_v11 = vpop.permute.xlu2 %1477 }
 0x308   : > { %v1464_v30 = vpop.permute.xlu1 %1463 }
 0x309   : > { %v1348_v63 = vpop.permute.xlu0 %1347  ;;  %v1769_v51 = vsel %vm1746_vm8, %v1736_v2, %v1464_v30 }
 0x30a   : > { %v1742_v50 = vsel %vm1713_vm7, %v1709_v57, %v1348_v63  ;;  %2430 = vmatmul.msk.f32.gmra.mxu2 %vm1788_vm9, %v1769_v51  ;;  %v1480_v16 = vpop.permute.xlu2 %1479  ;;  %v2079_v63 = vmul.f32 %v4101_v1, %v4101_v1 }
 0x30b   : > { %v1775_v17 = vsel %vm1746_vm8, %v1742_v50, %v1476_v58 }
 0x30c   : > { %2436 = vmatmul.msk.f32.gmra.mxu3 %vm1788_vm9, %v1775_v17  ;;  %v2080_v17 = vmul.f32 %v4129_v20, %v4129_v20 }
 0x30f   : > { %v1939_v10 = vpop.f32.mrf.mxu1 }
 0x310   : > { %v1921_v48 = vpop.f32.mrf.mxu0  ;;  %v4181_v9 = vadd.f32 %v4066_v47, %v1939_v10  ;;  %v1222_v25 = vpop.permute.xlu1 %1221 }
 0x311   : > { %v1922_v38 = vadd.f32 %v4066_v47, %v1921_v48  ;;  %v1210_v49 = vpop.permute.xlu0 %1209  ;;  %v1710_v29 = vsel %vm1680_vm6, %v3782_v18, %v1222_v25  ;;  %v2081_v48 = vmul.f32 %v4156_v19, %v4156_v19 }
 0x312   : > { %2013 = vst [vmem:[%s2537_s22 + $0x58] sm:$0xff] %v4181_v9  ;;  %v1704_v4 = vsel %vm1680_vm6, %v3725_v13, %v1210_v49  ;;  %v1354_v26 = vpop.permute.xlu2 %1353  ;;  %v2082_v49 = vmul.f32 %v4181_v9, %v4181_v9 }
 0x313   : > { %2007 = vst [vmem:[%s2537_s22 + $0x28] sm:$0xff] %v1922_v38  ;;  %v2038_v14 = vadd.f32 %v2037_v44, %v1922_v38  ;;  %v2076_v60 = vmul.f32 %v1922_v38, %v1922_v38  ;;  %v1737_v37 = vsel %vm1713_vm7, %v1704_v4, %v1338_v27 }
 0x315   : > { %v2107_v28 = vadd.f32 %v2106_v5, %v2076_v60 }
 0x318   : > { %v1466_v62 = vpop.permute.xlu1 %1465 }
 0x319   : > { %v1350_v41 = vpop.permute.xlu0 %1349  ;;  %v1770_v54 = vsel %vm1746_vm8, %v1737_v37, %v1466_v62 }
 0x31a   : > { %v1743_v36 = vsel %vm1713_vm7, %v1710_v29, %v1350_v41  ;;  %2431 = vmatmul.msk.f32.gmra.mxu2 %vm1788_vm9, %v1770_v54 }
 0x31b   : > { %v1776_v53 = vsel %vm1746_vm8, %v1743_v36, %v1478_v11 }
 0x31c   : > { %2437 = vmatmul.msk.f32.gmra.mxu3 %vm1788_vm9, %v1776_v53 }
 0x31d   : > { %v1960_v13 = vpop.f32.mrf.mxu2 }
 0x31e   : > { %v4198_v22 = vadd.f32 %v4066_v47, %v1960_v13 }
 0x31f   : > { %v1978_v18 = vpop.f32.mrf.mxu3 }
 0x320   : > { %2020 = vst [vmem:[%s2537_s22 + $0x90] sm:$0xff] %v4198_v22  ;;  %v4203_v59 = vadd.f32 %v4066_v47, %v1978_v18  ;;  %v1352_v44 = vpop.permute.xlu1 %1351 }
 0x321   : > { %v1224_v12 = vpop.permute.xlu0 %1223 }
 0x322   : > { %2026 = vst [vmem:[%s2537_s22 + $0xc0] sm:$0xff] %v4203_v59  ;;  %v1711_v32 = vsel %vm1680_vm6, %v3692_v52, %v1224_v12 }
 0x323   : > { %v1744_v5 = vsel %vm1713_vm7, %v1711_v32, %v1352_v44 }
 0x324   : > { %v1777_v0 = vsel %vm1746_vm8, %v1744_v5, %v1480_v16 }
 0x325   : > { %2438 = vmatmul.msk.f32.gmra.mxu3 %vm1788_vm9, %v1777_v0 }
 0x328   : > { %v1226_v6 = vpop.permute.xlu1 %1225 }
 0x329   : > { %v1098_v31 = vpop.permute.xlu0 %1097 }
 0x32a   : > { %v1679_v39 = vsel %vm1647_vm4, %v3509_v21, %v1098_v31 }
 0x32b   : > { %v1712_v34 = vsel %vm1680_vm6, %v1679_v39, %v1226_v6  ;;  %v2087_v6 = vmul.f32 %v4136_v3, %v4136_v3 }
 0x32c   : > { %v1745_v56 = vsel %vm1713_vm7, %v1712_v34, %v1354_v26 }
 0x32f   : > { %v1942_v15 = vpop.f32.mrf.mxu1 }
 0x330   : > { %v1924_v46 = vpop.f32.mrf.mxu0  ;;  %v1943_v52 = vadd.f32 %v4066_v47, %v1942_v15  ;;  %v2088_v15 = vmul.f32 %v4163_v8, %v4163_v8 }
 0x331   : > { %v1925_v55 = vadd.f32 %v4066_v47, %v1924_v46  ;;  %v1482_v45 = vpop.permute.xlu0 %1481 }
 0x332   : > { %2014 = vst [vmem:[%s2537_s22 + $0x60] sm:$0xff] %v1943_v52  ;;  %v1778_v61 = vsel %vm1746_vm8, %v1745_v56, %v1482_v45  ;;  %v2083_v60 = vmul.f32 %v1943_v52, %v1943_v52  ;;  %v2089_v56 = vmul.f32 %v4198_v22, %v4198_v22 }
 0x333   : > { %2008 = vst [vmem:[%s2537_s22 + $0x30] sm:$0xff] %v1925_v55  ;;  %v2039_v21 = vadd.f32 %v2038_v14, %v1925_v55  ;;  %v2077_v40 = vmul.f32 %v1925_v55, %v1925_v55  ;;  %2439 = vmatmul.msk.f32.gmra.mxu3 %vm1788_vm9, %v1778_v61 }
 0x335   : > { %v2108_v35 = vadd.f32 %v2107_v28, %v2077_v40 }
 0x33d   : > { %v1963_v33 = vpop.f32.mrf.mxu2 }
 0x33e   : > { %v4223_v43 = vadd.f32 %v4066_v47, %v1963_v33 }
 0x33f   : > { %v1981_v42 = vpop.f32.mrf.mxu3 }
 0x340   : > { %2021 = vst [vmem:[%s2537_s22 + $0x98] sm:$0xff] %v4223_v43  ;;  %v4228_v24 = vadd.f32 %v4066_v47, %v1981_v42  ;;  %v2090_v61 = vmul.f32 %v4223_v43, %v4223_v43 }
 0x342   : > { %2027 = vst [vmem:[%s2537_s22 + $0xc8] sm:$0xff] %v4228_v24 }
 0x34f   : > { %v1945_v7 = vpop.f32.mrf.mxu1 }
 0x350   : > { %v1927_v58 = vpop.f32.mrf.mxu0  ;;  %v1946_v23 = vadd.f32 %v4066_v47, %v1945_v7 }
 0x351   : > { %v1928_v2 = vadd.f32 %v4066_v47, %v1927_v58 }
 0x352   : > { %2015 = vst [vmem:[%s2537_s22 + $0x68] sm:$0xff] %v1946_v23  ;;  %v2084_v37 = vmul.f32 %v1946_v23, %v1946_v23 }
 0x353   : > { %2009 = vst [vmem:[%s2537_s22 + $0x38] sm:$0xff] %v1928_v2  ;;  %v2040_v57 = vadd.f32 %v2039_v21, %v1928_v2  ;;  %v2078_v30 = vmul.f32 %v1928_v2, %v1928_v2 }
 0x355   : > { %v2041_v50 = vadd.f32 %v2040_v57, %v4101_v1  ;;  %v2109_v51 = vadd.f32 %v2108_v35, %v2078_v30 }
 0x357   : > { %v2042_v27 = vadd.f32 %v2041_v50, %v4129_v20  ;;  %v2110_v10 = vadd.f32 %v2109_v51, %v2079_v63 }
 0x359   : > { %v2111_v38 = vadd.f32 %v2110_v10, %v2080_v17  ;;  %v2043_v25 = vadd.f32 %v2042_v27, %v4156_v19 }
 0x35b   : > { %v2044_v1 = vadd.f32 %v2043_v25, %v4181_v9  ;;  %v2112_v14 = vadd.f32 %v2111_v38, %v2081_v48  ;;  %v2095_v38 = vmul.f32 %v4203_v59, %v4203_v59 }
 0x35d   : > { %v2045_v28 = vadd.f32 %v2044_v1, %v1943_v52  ;;  %v2113_v4 = vadd.f32 %v2112_v14, %v2082_v49  ;;  %v1966_v20 = vpop.f32.mrf.mxu2  ;;  %v2096_v1 = vmul.f32 %v4228_v24, %v4228_v24 }
 0x35e   : > { %v1967_v11 = vadd.f32 %v4066_v47, %v1966_v20 }
 0x35f   : > { %v2046_v29 = vadd.f32 %v2045_v28, %v1946_v23  ;;  %v2114_v62 = vadd.f32 %v2113_v4, %v2083_v60  ;;  %v1984_v19 = vpop.f32.mrf.mxu3 }
 0x360   : > { %2022 = vst [vmem:[%s2537_s22 + $0xa0] sm:$0xff] %v1967_v11  ;;  %v4251_v41 = vadd.f32 %v4066_v47, %v1984_v19  ;;  %v2091_v40 = vmul.f32 %v1967_v11, %v1967_v11 }
 0x361   : > { %v2115_v36 = vadd.f32 %v2114_v62, %v2084_v37 }
 0x362   : > { %2028 = vst [vmem:[%s2537_s22 + $0xd0] sm:$0xff] %v4251_v41  ;;  %v2097_v28 = vmul.f32 %v4251_v41, %v4251_v41 }
 0x367   : > { %v1948_v9 = vpop.f32.mrf.mxu1 }
 0x368   : > { %v1949_v54 = vadd.f32 %v4066_v47, %v1948_v9 }
 0x36a   : > { %2016 = vst [vmem:[%s2537_s22 + $0x70] sm:$0xff] %v1949_v54  ;;  %v2085_v12 = vmul.f32 %v1949_v54, %v1949_v54  ;;  %v2047_v32 = vadd.f32 %v2046_v29, %v1949_v54 }
 0x36c   : > { %v2116_v0 = vadd.f32 %v2115_v36, %v2085_v12 }
 0x375   : > { %v1969_v53 = vpop.f32.mrf.mxu2 }
 0x376   : > { %v1970_v13 = vadd.f32 %v4066_v47, %v1969_v53 }
 0x377   : > { %v1987_v18 = vpop.f32.mrf.mxu3 }
 0x378   : > { %v1988_v16 = vadd.f32 %v4066_v47, %v1987_v18  ;;  %2023 = vst [vmem:[%s2537_s22 + $0xa8] sm:$0xff] %v1970_v13 }
 0x37a   : > { %2029 = vst [vmem:[%s2537_s22 + $0xd8] sm:$0xff] %v1988_v16  ;;  %v2098_v62 = vmul.f32 %v1988_v16, %v1988_v16 }
 0x37f   : > { %v1951_v44 = vpop.f32.mrf.mxu1 }
 0x380   : > { %v1952_v5 = vadd.f32 %v4066_v47, %v1951_v44 }
 0x382   : > { %2017 = vst [vmem:[%s2537_s22 + $0x78] sm:$0xff] %v1952_v5  ;;  %v2048_v31 = vadd.f32 %v2047_v32, %v1952_v5  ;;  %v2086_v39 = vmul.f32 %v1952_v5, %v1952_v5 }
 0x384   : > { %v2049_v34 = vadd.f32 %v2048_v31, %v4136_v3  ;;  %v2117_v26 = vadd.f32 %v2116_v0, %v2086_v39 }
 0x386   : > { %v2050_v46 = vadd.f32 %v2049_v34, %v4163_v8  ;;  %v2118_v52 = vadd.f32 %v2117_v26, %v2087_v6 }
 0x388   : > { %v2051_v55 = vadd.f32 %v2050_v46, %v4198_v22  ;;  %v2119_v45 = vadd.f32 %v2118_v52, %v2088_v15  ;;  %v2092_v22 = vmul.f32 %v1970_v13, %v1970_v13 }
 0x38a   : > { %v2120_v21 = vadd.f32 %v2119_v45, %v2089_v56  ;;  %v2052_v3 = vadd.f32 %v2051_v55, %v4223_v43 }
 0x38c   : > { %v2053_v35 = vadd.f32 %v2052_v3, %v1967_v11  ;;  %v2121_v33 = vadd.f32 %v2120_v21, %v2090_v61 }
 0x38d   : > { %v1972_v42 = vpop.f32.mrf.mxu2 }
 0x38e   : > { %v1973_v8 = vadd.f32 %v4066_v47, %v1972_v42  ;;  %v2122_v7 = vadd.f32 %v2121_v33, %v2091_v40  ;;  %v2054_v2 = vadd.f32 %v2053_v35, %v1970_v13 }
 0x38f   : > { %v1990_v58 = vpop.f32.mrf.mxu3 }
 0x390   : > { %v1991_v23 = vadd.f32 %v4066_v47, %v1990_v58  ;;  %2024 = vst [vmem:[%s2537_s22 + $0xb0] sm:$0xff] %v1973_v8  ;;  %v2093_v57 = vmul.f32 %v1973_v8, %v1973_v8  ;;  %v2123_v30 = vadd.f32 %v2122_v7, %v2092_v22  ;;  %v2055_v43 = vadd.f32 %v2054_v2, %v1973_v8 }
 0x392   : > { %2030 = vst [vmem:[%s2537_s22 + $0xe0] sm:$0xff] %v1991_v23  ;;  %v2124_v27 = vadd.f32 %v2123_v30, %v2093_v57  ;;  %v2099_v36 = vmul.f32 %v1991_v23, %v1991_v23 }
 0x39d   : > { %v1975_v63 = vpop.f32.mrf.mxu2 }
 0x39e   : > { %v1976_v50 = vadd.f32 %v4066_v47, %v1975_v63 }
 0x39f   : > { %v1993_v51 = vpop.f32.mrf.mxu3 }
 0x3a0   : > { %v1994_v17 = vadd.f32 %v4066_v47, %v1993_v51  ;;  %2025 = vst [vmem:[%s2537_s22 + $0xb8] sm:$0xff] %v1976_v50  ;;  %v2056_v10 = vadd.f32 %v2055_v43, %v1976_v50  ;;  %v2094_v48 = vmul.f32 %v1976_v50, %v1976_v50 }
 0x3a2   : > { %2031 = vst [vmem:[%s2537_s22 + $0xe8] sm:$0xff] %v1994_v17  ;;  %v2057_v25 = vadd.f32 %v2056_v10, %v4203_v59  ;;  %v2125_v49 = vadd.f32 %v2124_v27, %v2094_v48  ;;  %v2100_v53 = vmul.f32 %v1994_v17, %v1994_v17 }
 0x3a4   : > { %v2058_v14 = vadd.f32 %v2057_v25, %v4228_v24  ;;  %v2126_v60 = vadd.f32 %v2125_v49, %v2095_v38 }
 0x3a6   : > { %v2127_v4 = vadd.f32 %v2126_v60, %v2096_v1  ;;  %v2059_v20 = vadd.f32 %v2058_v14, %v4251_v41 }
 0x3a8   : > { %v1996_v11 = vpop.f32.mrf.mxu3  ;;  %v2128_v29 = vadd.f32 %v2127_v4, %v2097_v28  ;;  %v2060_v59 = vadd.f32 %v2059_v20, %v1988_v16 }
 0x3a9   : > { %v1997_v37 = vadd.f32 %v4066_v47, %v1996_v11 }
 0x3aa   : > { %v2129_v19 = vadd.f32 %v2128_v29, %v2098_v62  ;;  %v2061_v9 = vadd.f32 %v2060_v59, %v1991_v23 }
 0x3ab   : > { %2032 = vst [vmem:[%s2537_s22 + $0xf0] sm:$0xff] %v1997_v37  ;;  %v2101_v44 = vmul.f32 %v1997_v37, %v1997_v37 }
 0x3ac   : > { %v2130_v54 = vadd.f32 %v2129_v19, %v2099_v36  ;;  %v2062_v24 = vadd.f32 %v2061_v9, %v1994_v17 }
 0x3ae   : > { %v2131_v13 = vadd.f32 %v2130_v54, %v2100_v53  ;;  %v2063_v12 = vadd.f32 %v2062_v24, %v1997_v37 }
 0x3b0   : > { %v2132_v32 = vadd.f32 %v2131_v13, %v2101_v44 }
 0x3b6   : > { %v1999_v18 = vpop.f32.mrf.mxu3 }
 0x3b7   : > { %v2000_v41 = vadd.f32 %v4066_v47, %v1999_v18  ;;  %v2140_v47 = vld [vmem:[%s4309_s4] sm:$0x3] }
 0x3b9   : > { %2033 = vst [vmem:[%s2537_s22 + $0xf8] sm:$0xff] %v2000_v41  ;;  %v2064_v5 = vadd.f32 %v2063_v12, %v2000_v41  ;;  %v2102_v0 = vmul.f32 %v2000_v41, %v2000_v41 }
 0x3bb   : > { %v2065_v31 = vrot.slane %v2064_v5, 4  ;;  %v2133_v39 = vadd.f32 %v2132_v32, %v2102_v0 }
 0x3bd   : > { %v2066_v16 = vadd.f32 %v2065_v31, %v2064_v5  ;;  %v2134_v6 = vrot.slane %v2133_v39, 4 }
 0x3bf   : > { %v2067_v34 = vrot.slane %v2066_v16, 2  ;;  %v2135_v26 = vadd.f32 %v2134_v6, %v2133_v39 }
 0x3c1   : > { %v2068_v15 = vadd.f32 %v2067_v34, %v2066_v16  ;;  %v2136_v46 = vrot.slane %v2135_v26, 2 }
 0x3c3   : > { %v2069_v52 = vrot.slane %v2068_v15, 1  ;;  %v2137_v56 = vadd.f32 %v2136_v46, %v2135_v26 }
 0x3c5   : > { %v2138_v55 = vrot.slane %v2137_v56, 1  ;;  %v2070_v45 = vadd.f32 %v2069_v52, %v2068_v15 }
 0x3c7   : > { %v2139_v61 = vadd.f32 %v2138_v55, %v2137_v56 }
 0x3c9   : > { %v2142_v21 = vsel %vm2141_vm10, %v2070_v45, %v2139_v61 }
 0x3ca   : > { %v2143_v3 = vadd.f32 %v2142_v21, %v2140_v47 }
 0x3cc   : > { %2144 = vst [vmem:[%s4309_s4] sm:$0x3] %v2143_v3 }
 0x3cd PF: > { %s15_s15 = sadd.s32 1, %s2490_s15  }
 0x3ce   : > { %p12_p5 = scmp.ge.s32.totalorder %s15_s15, 4  }
 0x3d0   :  { %14 = sbr.rel (!%p12_p5) target bundleno = 1 (0x1), region = 76 }

</bundles_post_ra>
